<compile_context>
chip_gen: v7x
topology: tpu7x:2x2x1
jax: 0.10.0
libtpu: 0.0.40
codegen_flags: <defaults>
</compile_context>

<pallas_src>
import functools

import numpy as np
import jax
import jax.numpy as jnp
from jax.experimental import pallas as pl
from jax.experimental.pallas import tpu as pltpu


# ----------------------------------------------------------------------------
# Ring template (deterministic from config -> baked into the kernel as consts)
# ----------------------------------------------------------------------------
def _create_ring_np(ring_type: str, size: int) -> np.ndarray:
    t = np.linspace(0.0, 2.0 * np.pi, size, dtype=np.float32)
    if ring_type == "triangle":
        u = t / np.float32(2.0 * np.pi)
        return (2.0 * np.abs(2.0 * (u - np.floor(u + 0.5))) - 1.0).astype(np.float32)
    if ring_type == "sin":
        return np.sin(t).astype(np.float32)
    raise ValueError(f"Unknown ring type: {ring_type}")


def _pick_h_tile(OH: int, OW: int) -> int:
    """Output-row tile TH (divisor of OH) so the flattened spatial block TH*OW is
    lane-dense (multiple of 128) and VMEM-friendly; prefer >1 tile per image so the
    pipeline has more than N grid steps."""
    cands = [th for th in range(1, OH + 1)
             if OH % th == 0 and (th * OW) % 128 == 0 and th * OW <= 2048]
    if not cands:
        return OH
    multi = [th for th in cands if OH // th >= 2]
    return max(multi) if multi else max(cands)


# ----------------------------------------------------------------------------
# Fused Pallas kernel: ring interpolation + zero-pad + im2col conv (one matmul)
# ----------------------------------------------------------------------------
def _ring_conv_kernel(x_ref, wpos_ref, bpos_ref, out_ref, xpad_ref, *,
                      ring_vals, sigma, stride, padding, H, W, KH, KW, TH, OW,
                      use_bias, compute_dtype):
    C = x_ref.shape[1]
    OC, K = wpos_ref.shape
    R = len(ring_vals)
    h = pl.program_id(1)

    # ---- zero-pad the current image into VMEM scratch (once per batch element).
    # The spatial-tile axis h is "arbitrary" (sequential per core), so h == 0 always
    # runs first for every batch element on whichever core owns it.
    @pl.when(h == 0)
    def _pad():
        if padding > 0:
            xpad_ref[...] = jnp.zeros_like(xpad_ref)
        xpad_ref[:, padding:padding + H, padding:padding + W] = (
            x_ref[0].astype(xpad_ref.dtype))

    # ---- fused Gaussian-kernel ring interpolation (a few hundred scalars).
    # Fully elementwise (VPU + EUP), unrolled over the R ring sites; recomputed every
    # grid step so the kernel stays megacore-safe -- the cost is negligible.
    def interp(pos):
        rp = pos * float(R)
        logits = []
        for r in range(R):
            d = jnp.abs(rp - float(r))
            cd = jnp.minimum(d, float(R) - d)
            logits.append(-0.5 * (cd / sigma) ** 2)
        m = functools.reduce(jnp.maximum, logits)
        num = jnp.zeros_like(rp)
        den = jnp.zeros_like(rp)
        for r in range(R):
            e = jnp.exp(logits[r] - m)
            den = den + e
            num = num + e * float(ring_vals[r])
        return num / den

    w_mat = interp(wpos_ref[...]).astype(compute_dtype)          # (OC, KH*KW*C)

    # ---- im2col for this output row band: one lane-dense MXU matmul.
    row0 = pl.multiple_of(h * (TH * stride), TH * stride)
    taps = []
    for kh in range(KH):
        for kw in range(KW):
            if stride == 1:
                patch = xpad_ref[:, pl.ds(row0 + kh, TH), kw:kw + OW]
            else:
                # TODO(synk): for v5e, pre-split the input into stride^2 phase planes in
                # the wrapper instead of strided sublane/lane reads inside the kernel.
                patch = xpad_ref[:, pl.ds(row0 + kh, TH, stride=stride),
                                 pl.ds(kw, OW, stride=stride)]
            taps.append(patch.reshape(C, TH * OW))
    x2 = jnp.concatenate(taps, axis=0).astype(compute_dtype)     # (KH*KW*C, TH*OW)

    acc = jnp.dot(w_mat, x2, preferred_element_type=jnp.float32)  # (OC, TH*OW) f32
    if use_bias:
        acc = acc + interp(bpos_ref[...])                        # (OC, 1) broadcast
    out_ref[0] = acc.astype(out_ref.dtype)


# ----------------------------------------------------------------------------
# RingConv2d forward (public wrapper: NCHW in / NCHW out, OIHW semantics)
# ----------------------------------------------------------------------------
def ring_conv2d_forward(x_nchw, positions, bias_positions, *, in_channels,
                        out_channels, kernel_size, stride=1, padding=1,
                        ring_size=8, ring_type="triangle",
                        compute_dtype=jnp.bfloat16):
    KH, KW = (kernel_size if isinstance(kernel_size, (tuple, list))
              else (kernel_size, kernel_size))
    N, C, H, W = x_nchw.shape
    assert C == in_channels
    OC = out_channels
    HP, WP = H + 2 * padding, W + 2 * padding
    OH = (HP - KH) // stride + 1
    OW = (WP - KW) // stride + 1
    K = KH * KW * C
    TH = _pick_h_tile(OH, OW)
    n_h = OH // TH

    # Re-order positions so the contraction index is (kh, kw, c), matching the im2col
    # row order built inside the kernel (tiny host-side gather over ~n_weights floats).
    wpos = (positions.reshape(OC, C, KH, KW).transpose(0, 2, 3, 1)
            .reshape(OC, K).astype(jnp.float32))
    use_bias = bias_positions is not None
    bpos = (bias_positions.reshape(OC, 1) if use_bias
            else jnp.zeros((OC, 1))).astype(jnp.float32)

    ring_vals = tuple(float(v) for v in _create_ring_np(ring_type, ring_size))
    sigma = float(max(0.5, ring_size / 32.0))

    kernel = functools.partial(
        _ring_conv_kernel, ring_vals=ring_vals, sigma=sigma, stride=stride,
        padding=padding, H=H, W=W, KH=KH, KW=KW, TH=TH, OW=OW,
        use_bias=use_bias, compute_dtype=compute_dtype)

    # Rough VMEM budget (double-buffered blocks + pad scratch + im2col temporaries),
    # clamped to stay well inside v7x's 64 MiB while giving the compiler headroom.
    def rup(v, m):
        return (v + m - 1) // m * m
    est = (2 * C * rup(H, 8) * rup(W, 128) * 4
           + 2 * rup(OC, 8) * rup(TH * OW, 128) * 4
           + C * rup(HP, 8) * rup(WP, 128) * 4
           + 2 * rup(OC, 8) * rup(K, 128) * 4
           + 4 * rup(K, 8) * rup(TH * OW, 128) * 4
           + (1 << 20))
    vmem_limit = int(min(max(4 * est, 16 << 20), 48 << 20))

    x_f32 = x_nchw if x_nchw.dtype == jnp.float32 else x_nchw.astype(jnp.float32)

    out_flat = pl.pallas_call(
        kernel,
        out_shape=jax.ShapeDtypeStruct((N, OC, OH * OW), jnp.float32),
        grid=(N, n_h),
        in_specs=[
            # Full image per batch element; re-DMA'd only when the batch index changes
            # (index_map ignores h), so the n_h spatial steps reuse the resident block.
            # TODO(synk): for images too large for VMEM, also tile W or keep x in HBM
            # (memory_space=pl.ANY) and manually DMA row bands with halo.
            pl.BlockSpec((1, C, H, W), lambda n, h: (n, 0, 0, 0)),
            pl.BlockSpec((OC, K), lambda n, h: (0, 0)),
            pl.BlockSpec((OC, 1), lambda n, h: (0, 0)),
        ],
        out_specs=pl.BlockSpec((1, OC, TH * OW), lambda n, h: (n, 0, h)),
        scratch_shapes=[pltpu.VMEM((C, HP, WP), jnp.float32)],
        compiler_params=pltpu.CompilerParams(
            dimension_semantics=("parallel", "arbitrary"),
            vmem_limit_bytes=vmem_limit),
    )(x_f32, wpos, bpos)

    return out_flat.reshape(N, OC, OH, OW)


# ----------------------------------------------------------------------------
# Pure-JAX reference (mirrors the PyTorch module) for verification
# ----------------------------------------------------------------------------
def _reference_forward(x, positions, bias_positions, *, in_channels, out_channels,
                       kernel_size, stride, padding, ring_size, ring_type):
    ring = jnp.asarray(_create_ring_np(ring_type, ring_size))

    def interp(p):
        rp = p * ring_size
        idx = jnp.arange(ring_size, dtype=jnp.float32)
        d = jnp.abs(rp[:, None] - idx[None, :])
        cd = jnp.minimum(d, ring_size - d)
        sigma = max(0.5, ring_size / 32.0)
        attn = jax.nn.softmax(-0.5 * (cd / sigma) ** 2, axis=-1)
        return attn @ ring

    KH, KW = kernel_size
    w = interp(positions).reshape(out_channels, in_channels, KH, KW)
    out = jax.lax.conv_general_dilated(
        x.astype(jnp.float32), w, (stride, stride),
        [(padding, padding), (padding, padding)],
        dimension_numbers=("NCHW", "OIHW", "NCHW"))
    if bias_positions is not None:
        out = out + interp(bias_positions)[None, :, None, None]
    return out


if __name__ == "__main__":
    # Module config (matches RingConv2d defaults)
    in_channels, out_channels, kernel_size = 4, 8, (3, 3)
    stride, padding = 1, 1
    ring_size, ring_type = 8, "triangle"

    key = jax.random.PRNGKey(0)
    k_x, k_pos, k_bias = jax.random.split(key, 3)

    # Deterministic parameters (torch.rand ~ uniform[0,1))
    n_weights = out_channels * in_channels * kernel_size[0] * kernel_size[1]
    positions = jax.random.uniform(k_pos, (n_weights,), dtype=jnp.float32)
    bias_positions = jax.random.uniform(k_bias, (out_channels,), dtype=jnp.float32)

    # Input, NCHW like PyTorch
    x = jax.random.normal(k_x, (2, 4, 16, 16), dtype=jnp.float32)

    cfg = dict(in_channels=in_channels, out_channels=out_channels,
               kernel_size=kernel_size, stride=stride, padding=padding,
               ring_size=ring_size, ring_type=ring_type)

    # Performance config: bf16 MXU operands, f32 accumulation.
    out = ring_conv2d_forward(x, positions, bias_positions, **cfg)
    out = jax.block_until_ready(out)

    # Strict-accuracy config (f32 operands) to verify indexing / fused interpolation.
    out_f32 = ring_conv2d_forward(x, positions, bias_positions,
                                  compute_dtype=jnp.float32, **cfg)
    out_f32 = jax.block_until_ready(out_f32)

    ref = _reference_forward(x, positions, bias_positions, **cfg)
    assert out.shape == out_f32.shape == ref.shape == (2, out_channels, 16, 16)
    np.testing.assert_allclose(np.asarray(out_f32), np.asarray(ref),
                               rtol=1e-4, atol=1e-4)
    # bf16 operands: loosened tolerance (per review note); still catches indexing bugs.
    np.testing.assert_allclose(np.asarray(out), np.asarray(ref),
                               rtol=5e-2, atol=1e-1)

    print("KERNEL_OK")
</pallas_src>

<mosaic_0001>
module attributes {stable_mosaic.version = 11 : i64} {
  func.func @_ring_conv_kernel(%arg0: i32, %arg1: i32, %arg2: memref<1x4x16x16xf32, #tpu.memory_space<vmem>>, %arg3: memref<8x36xf32, #tpu.memory_space<vmem>>, %arg4: memref<8x1xf32, #tpu.memory_space<vmem>>, %arg5: memref<1x8x128xf32, #tpu.memory_space<vmem>>, %arg6: memref<4x18x18xf32, #tpu.memory_space<vmem>>) attributes {dimension_semantics = [#tpu.dimension_semantics<parallel>, #tpu.dimension_semantics<arbitrary>], iteration_bounds = array<i64: 2, 2>, scalar_prefetch = 0 : i64, scratch_operands = 1 : i64, tpu.core_type = #tpu.core_type<tc>, window_params = [{transform_indices = @transform_0, window_bounds = array<i64: 1, 4, 16, 16>}, {pipeline_mode = #tpu.pipeline_mode<synchronous>, transform_indices = @transform_1, window_bounds = array<i64: 8, 36>}, {pipeline_mode = #tpu.pipeline_mode<synchronous>, transform_indices = @transform_2, window_bounds = array<i64: 8, 1>}, {transform_indices = @transform_3, window_bounds = array<i64: 1, 8, 128>}]} {
    %c0_i32 = arith.constant 0 : i32
    %0 = arith.cmpi eq, %arg1, %c0_i32 : i32
    %1 = arith.extui %0 : i1 to i32
    %c0_i32_0 = arith.constant 0 : i32
    %2 = arith.cmpi ne, %1, %c0_i32_0 : i32
    scf.if %2 {
      %cst_116 = arith.constant 0.000000e+00 : f32
      %348 = vector.broadcast %cst_116 : f32 to vector<4x18x18xf32>
      %c0_117 = arith.constant 0 : index
      %c0_118 = arith.constant 0 : index
      %c0_119 = arith.constant 0 : index
      %349 = vector.load %arg6[%c0_117, %c0_118, %c0_119] : memref<4x18x18xf32, #tpu.memory_space<vmem>>, vector<4x18x18xf32>
      tpu.vector_store %arg6[%c0_117, %c0_118, %c0_119], %348 {strides = array<i32>} : memref<4x18x18xf32, #tpu.memory_space<vmem>>, vector<4x18x18xf32>,
      %c0_120 = arith.constant 0 : index
      %c0_121 = arith.constant 0 : index
      %c0_122 = arith.constant 0 : index
      %c0_123 = arith.constant 0 : index
      %350 = vector.load %arg2[%c0_120, %c0_121, %c0_122, %c0_123] : memref<1x4x16x16xf32, #tpu.memory_space<vmem>>, vector<1x4x16x16xf32>
      %351 = vector.shape_cast %350 : vector<1x4x16x16xf32> to vector<4x16x16xf32>
      %c0_124 = arith.constant 0 : index
      %c1_125 = arith.constant 1 : index
      %c1_126 = arith.constant 1 : index
      %352 = vector.load %arg6[%c0_124, %c1_125, %c1_126] : memref<4x18x18xf32, #tpu.memory_space<vmem>>, vector<4x16x16xf32>
      tpu.vector_store %arg6[%c0_124, %c1_125, %c1_126], %351 {strides = array<i32>} : memref<4x18x18xf32, #tpu.memory_space<vmem>>, vector<4x16x16xf32>,
    } else {
    }
    %c0 = arith.constant 0 : index
    %c0_1 = arith.constant 0 : index
    %3 = vector.load %arg3[%c0, %c0_1] : memref<8x36xf32, #tpu.memory_space<vmem>>, vector<8x36xf32>
    %cst = arith.constant 8.000000e+00 : f32
    %4 = vector.broadcast %cst : f32 to vector<8x36xf32>
    %5 = arith.mulf %3, %4 : vector<8x36xf32>
    %cst_2 = arith.constant 0.000000e+00 : f32
    %6 = vector.broadcast %cst_2 : f32 to vector<8x36xf32>
    %7 = arith.subf %5, %6 : vector<8x36xf32>
    %8 = math.absf %7 : vector<8x36xf32>
    %cst_3 = arith.constant 8.000000e+00 : f32
    %9 = vector.broadcast %cst_3 : f32 to vector<8x36xf32>
    %10 = arith.subf %9, %8 : vector<8x36xf32>
    %11 = arith.minimumf %8, %10 : vector<8x36xf32>
    %cst_4 = arith.constant 5.000000e-01 : f32
    %12 = vector.broadcast %cst_4 : f32 to vector<8x36xf32>
    %13 = arith.divf %11, %12 : vector<8x36xf32>
    %14 = arith.mulf %13, %13 : vector<8x36xf32>
    %cst_5 = arith.constant -5.000000e-01 : f32
    %15 = vector.broadcast %cst_5 : f32 to vector<8x36xf32>
    %16 = arith.mulf %15, %14 : vector<8x36xf32>
    %cst_6 = arith.constant 1.000000e+00 : f32
    %17 = vector.broadcast %cst_6 : f32 to vector<8x36xf32>
    %18 = arith.subf %5, %17 : vector<8x36xf32>
    %19 = math.absf %18 : vector<8x36xf32>
    %cst_7 = arith.constant 8.000000e+00 : f32
    %20 = vector.broadcast %cst_7 : f32 to vector<8x36xf32>
    %21 = arith.subf %20, %19 : vector<8x36xf32>
    %22 = arith.minimumf %19, %21 : vector<8x36xf32>
    %cst_8 = arith.constant 5.000000e-01 : f32
    %23 = vector.broadcast %cst_8 : f32 to vector<8x36xf32>
    %24 = arith.divf %22, %23 : vector<8x36xf32>
    %25 = arith.mulf %24, %24 : vector<8x36xf32>
    %cst_9 = arith.constant -5.000000e-01 : f32
    %26 = vector.broadcast %cst_9 : f32 to vector<8x36xf32>
    %27 = arith.mulf %26, %25 : vector<8x36xf32>
    %cst_10 = arith.constant 2.000000e+00 : f32
    %28 = vector.broadcast %cst_10 : f32 to vector<8x36xf32>
    %29 = arith.subf %5, %28 : vector<8x36xf32>
    %30 = math.absf %29 : vector<8x36xf32>
    %cst_11 = arith.constant 8.000000e+00 : f32
    %31 = vector.broadcast %cst_11 : f32 to vector<8x36xf32>
    %32 = arith.subf %31, %30 : vector<8x36xf32>
    %33 = arith.minimumf %30, %32 : vector<8x36xf32>
    %cst_12 = arith.constant 5.000000e-01 : f32
    %34 = vector.broadcast %cst_12 : f32 to vector<8x36xf32>
    %35 = arith.divf %33, %34 : vector<8x36xf32>
    %36 = arith.mulf %35, %35 : vector<8x36xf32>
    %cst_13 = arith.constant -5.000000e-01 : f32
    %37 = vector.broadcast %cst_13 : f32 to vector<8x36xf32>
    %38 = arith.mulf %37, %36 : vector<8x36xf32>
    %cst_14 = arith.constant 3.000000e+00 : f32
    %39 = vector.broadcast %cst_14 : f32 to vector<8x36xf32>
    %40 = arith.subf %5, %39 : vector<8x36xf32>
    %41 = math.absf %40 : vector<8x36xf32>
    %cst_15 = arith.constant 8.000000e+00 : f32
    %42 = vector.broadcast %cst_15 : f32 to vector<8x36xf32>
    %43 = arith.subf %42, %41 : vector<8x36xf32>
    %44 = arith.minimumf %41, %43 : vector<8x36xf32>
    %cst_16 = arith.constant 5.000000e-01 : f32
    %45 = vector.broadcast %cst_16 : f32 to vector<8x36xf32>
    %46 = arith.divf %44, %45 : vector<8x36xf32>
    %47 = arith.mulf %46, %46 : vector<8x36xf32>
    %cst_17 = arith.constant -5.000000e-01 : f32
    %48 = vector.broadcast %cst_17 : f32 to vector<8x36xf32>
    %49 = arith.mulf %48, %47 : vector<8x36xf32>
    %cst_18 = arith.constant 4.000000e+00 : f32
    %50 = vector.broadcast %cst_18 : f32 to vector<8x36xf32>
    %51 = arith.subf %5, %50 : vector<8x36xf32>
    %52 = math.absf %51 : vector<8x36xf32>
    %cst_19 = arith.constant 8.000000e+00 : f32
    %53 = vector.broadcast %cst_19 : f32 to vector<8x36xf32>
    %54 = arith.subf %53, %52 : vector<8x36xf32>
    %55 = arith.minimumf %52, %54 : vector<8x36xf32>
    %cst_20 = arith.constant 5.000000e-01 : f32
    %56 = vector.broadcast %cst_20 : f32 to vector<8x36xf32>
    %57 = arith.divf %55, %56 : vector<8x36xf32>
    %58 = arith.mulf %57, %57 : vector<8x36xf32>
    %cst_21 = arith.constant -5.000000e-01 : f32
    %59 = vector.broadcast %cst_21 : f32 to vector<8x36xf32>
    %60 = arith.mulf %59, %58 : vector<8x36xf32>
    %cst_22 = arith.constant 5.000000e+00 : f32
    %61 = vector.broadcast %cst_22 : f32 to vector<8x36xf32>
    %62 = arith.subf %5, %61 : vector<8x36xf32>
    %63 = math.absf %62 : vector<8x36xf32>
    %cst_23 = arith.constant 8.000000e+00 : f32
    %64 = vector.broadcast %cst_23 : f32 to vector<8x36xf32>
    %65 = arith.subf %64, %63 : vector<8x36xf32>
    %66 = arith.minimumf %63, %65 : vector<8x36xf32>
    %cst_24 = arith.constant 5.000000e-01 : f32
    %67 = vector.broadcast %cst_24 : f32 to vector<8x36xf32>
    %68 = arith.divf %66, %67 : vector<8x36xf32>
    %69 = arith.mulf %68, %68 : vector<8x36xf32>
    %cst_25 = arith.constant -5.000000e-01 : f32
    %70 = vector.broadcast %cst_25 : f32 to vector<8x36xf32>
    %71 = arith.mulf %70, %69 : vector<8x36xf32>
    %cst_26 = arith.constant 6.000000e+00 : f32
    %72 = vector.broadcast %cst_26 : f32 to vector<8x36xf32>
    %73 = arith.subf %5, %72 : vector<8x36xf32>
    %74 = math.absf %73 : vector<8x36xf32>
    %cst_27 = arith.constant 8.000000e+00 : f32
    %75 = vector.broadcast %cst_27 : f32 to vector<8x36xf32>
    %76 = arith.subf %75, %74 : vector<8x36xf32>
    %77 = arith.minimumf %74, %76 : vector<8x36xf32>
    %cst_28 = arith.constant 5.000000e-01 : f32
    %78 = vector.broadcast %cst_28 : f32 to vector<8x36xf32>
    %79 = arith.divf %77, %78 : vector<8x36xf32>
    %80 = arith.mulf %79, %79 : vector<8x36xf32>
    %cst_29 = arith.constant -5.000000e-01 : f32
    %81 = vector.broadcast %cst_29 : f32 to vector<8x36xf32>
    %82 = arith.mulf %81, %80 : vector<8x36xf32>
    %cst_30 = arith.constant 7.000000e+00 : f32
    %83 = vector.broadcast %cst_30 : f32 to vector<8x36xf32>
    %84 = arith.subf %5, %83 : vector<8x36xf32>
    %85 = math.absf %84 : vector<8x36xf32>
    %cst_31 = arith.constant 8.000000e+00 : f32
    %86 = vector.broadcast %cst_31 : f32 to vector<8x36xf32>
    %87 = arith.subf %86, %85 : vector<8x36xf32>
    %88 = arith.minimumf %85, %87 : vector<8x36xf32>
    %cst_32 = arith.constant 5.000000e-01 : f32
    %89 = vector.broadcast %cst_32 : f32 to vector<8x36xf32>
    %90 = arith.divf %88, %89 : vector<8x36xf32>
    %91 = arith.mulf %90, %90 : vector<8x36xf32>
    %cst_33 = arith.constant -5.000000e-01 : f32
    %92 = vector.broadcast %cst_33 : f32 to vector<8x36xf32>
    %93 = arith.mulf %92, %91 : vector<8x36xf32>
    %94 = arith.maximumf %16, %27 : vector<8x36xf32>
    %95 = arith.maximumf %94, %38 : vector<8x36xf32>
    %96 = arith.maximumf %95, %49 : vector<8x36xf32>
    %97 = arith.maximumf %96, %60 : vector<8x36xf32>
    %98 = arith.maximumf %97, %71 : vector<8x36xf32>
    %99 = arith.maximumf %98, %82 : vector<8x36xf32>
    %100 = arith.maximumf %99, %93 : vector<8x36xf32>
    %cst_34 = arith.constant 0.000000e+00 : f32
    %101 = vector.broadcast %cst_34 : f32 to vector<8x36xf32>
    %cst_35 = arith.constant 0.000000e+00 : f32
    %102 = vector.broadcast %cst_35 : f32 to vector<8x36xf32>
    %103 = arith.subf %16, %100 : vector<8x36xf32>
    %104 = math.exp %103 : vector<8x36xf32>
    %105 = arith.addf %102, %104 : vector<8x36xf32>
    %cst_36 = arith.constant -1.000000e+00 : f32
    %106 = vector.broadcast %cst_36 : f32 to vector<8x36xf32>
    %107 = arith.mulf %104, %106 : vector<8x36xf32>
    %108 = arith.addf %101, %107 : vector<8x36xf32>
    %109 = arith.subf %27, %100 : vector<8x36xf32>
    %110 = math.exp %109 : vector<8x36xf32>
    %111 = arith.addf %105, %110 : vector<8x36xf32>
    %cst_37 = arith.constant -0.428571463 : f32
    %112 = vector.broadcast %cst_37 : f32 to vector<8x36xf32>
    %113 = arith.mulf %110, %112 : vector<8x36xf32>
    %114 = arith.addf %108, %113 : vector<8x36xf32>
    %115 = arith.subf %38, %100 : vector<8x36xf32>
    %116 = math.exp %115 : vector<8x36xf32>
    %117 = arith.addf %111, %116 : vector<8x36xf32>
    %cst_38 = arith.constant 0.142857075 : f32
    %118 = vector.broadcast %cst_38 : f32 to vector<8x36xf32>
    %119 = arith.mulf %116, %118 : vector<8x36xf32>
    %120 = arith.addf %114, %119 : vector<8x36xf32>
    %121 = arith.subf %49, %100 : vector<8x36xf32>
    %122 = math.exp %121 : vector<8x36xf32>
    %123 = arith.addf %117, %122 : vector<8x36xf32>
    %cst_39 = arith.constant 0.714285612 : f32
    %124 = vector.broadcast %cst_39 : f32 to vector<8x36xf32>
    %125 = arith.mulf %122, %124 : vector<8x36xf32>
    %126 = arith.addf %120, %125 : vector<8x36xf32>
    %127 = arith.subf %60, %100 : vector<8x36xf32>
    %128 = math.exp %127 : vector<8x36xf32>
    %129 = arith.addf %123, %128 : vector<8x36xf32>
    %cst_40 = arith.constant 0.714285851 : f32
    %130 = vector.broadcast %cst_40 : f32 to vector<8x36xf32>
    %131 = arith.mulf %128, %130 : vector<8x36xf32>
    %132 = arith.addf %126, %131 : vector<8x36xf32>
    %133 = arith.subf %71, %100 : vector<8x36xf32>
    %134 = math.exp %133 : vector<8x36xf32>
    %135 = arith.addf %129, %134 : vector<8x36xf32>
    %cst_41 = arith.constant 0.142857313 : f32
    %136 = vector.broadcast %cst_41 : f32 to vector<8x36xf32>
    %137 = arith.mulf %134, %136 : vector<8x36xf32>
    %138 = arith.addf %132, %137 : vector<8x36xf32>
    %139 = arith.subf %82, %100 : vector<8x36xf32>
    %140 = math.exp %139 : vector<8x36xf32>
    %141 = arith.addf %135, %140 : vector<8x36xf32>
    %cst_42 = arith.constant -0.428571224 : f32
    %142 = vector.broadcast %cst_42 : f32 to vector<8x36xf32>
    %143 = arith.mulf %140, %142 : vector<8x36xf32>
    %144 = arith.addf %138, %143 : vector<8x36xf32>
    %145 = arith.subf %93, %100 : vector<8x36xf32>
    %146 = math.exp %145 : vector<8x36xf32>
    %147 = arith.addf %141, %146 : vector<8x36xf32>
    %cst_43 = arith.constant -1.000000e+00 : f32
    %148 = vector.broadcast %cst_43 : f32 to vector<8x36xf32>
    %149 = arith.mulf %146, %148 : vector<8x36xf32>
    %150 = arith.addf %144, %149 : vector<8x36xf32>
    %151 = arith.divf %150, %147 : vector<8x36xf32>
    %152 = arith.truncf %151 : vector<8x36xf32> to vector<8x36xbf16>
    %c8_i32 = arith.constant 8 : i32
    %153 = arith.muli %arg1, %c8_i32 : i32
    %154 = tpu.assume_multiple %153, 8 : i32
    %c0_i32_44 = arith.constant 0 : i32
    %155 = arith.addi %154, %c0_i32_44 : i32
    %c0_45 = arith.constant 0 : index
    %156 = arith.index_cast %155 : i32 to index
    %c0_46 = arith.constant 0 : index
    %157 = vector.load %arg6[%c0_45, %156, %c0_46] : memref<4x18x18xf32, #tpu.memory_space<vmem>>, vector<4x8x16xf32>
    %158 = vector.shape_cast %157 : vector<4x8x16xf32> to vector<4x128xf32>
    %c0_i32_47 = arith.constant 0 : i32
    %159 = arith.addi %154, %c0_i32_47 : i32
    %c0_48 = arith.constant 0 : index
    %160 = arith.index_cast %159 : i32 to index
    %c1 = arith.constant 1 : index
    %161 = vector.load %arg6[%c0_48, %160, %c1] : memref<4x18x18xf32, #tpu.memory_space<vmem>>, vector<4x8x16xf32>
    %162 = vector.shape_cast %161 : vector<4x8x16xf32> to vector<4x128xf32>
    %c0_i32_49 = arith.constant 0 : i32
    %163 = arith.addi %154, %c0_i32_49 : i32
    %c0_50 = arith.constant 0 : index
    %164 = arith.index_cast %163 : i32 to index
    %c2 = arith.constant 2 : index
    %165 = vector.load %arg6[%c0_50, %164, %c2] : memref<4x18x18xf32, #tpu.memory_space<vmem>>, vector<4x8x16xf32>
    %166 = vector.shape_cast %165 : vector<4x8x16xf32> to vector<4x128xf32>
    %c1_i32 = arith.constant 1 : i32
    %167 = arith.addi %154, %c1_i32 : i32
    %c0_51 = arith.constant 0 : index
    %168 = arith.index_cast %167 : i32 to index
    %c0_52 = arith.constant 0 : index
    %169 = vector.load %arg6[%c0_51, %168, %c0_52] : memref<4x18x18xf32, #tpu.memory_space<vmem>>, vector<4x8x16xf32>
    %170 = vector.shape_cast %169 : vector<4x8x16xf32> to vector<4x128xf32>
    %c1_i32_53 = arith.constant 1 : i32
    %171 = arith.addi %154, %c1_i32_53 : i32
    %c0_54 = arith.constant 0 : index
    %172 = arith.index_cast %171 : i32 to index
    %c1_55 = arith.constant 1 : index
    %173 = vector.load %arg6[%c0_54, %172, %c1_55] : memref<4x18x18xf32, #tpu.memory_space<vmem>>, vector<4x8x16xf32>
    %174 = vector.shape_cast %173 : vector<4x8x16xf32> to vector<4x128xf32>
    %c1_i32_56 = arith.constant 1 : i32
    %175 = arith.addi %154, %c1_i32_56 : i32
    %c0_57 = arith.constant 0 : index
    %176 = arith.index_cast %175 : i32 to index
    %c2_58 = arith.constant 2 : index
    %177 = vector.load %arg6[%c0_57, %176, %c2_58] : memref<4x18x18xf32, #tpu.memory_space<vmem>>, vector<4x8x16xf32>
    %178 = vector.shape_cast %177 : vector<4x8x16xf32> to vector<4x128xf32>
    %c2_i32 = arith.constant 2 : i32
    %179 = arith.addi %154, %c2_i32 : i32
    %c0_59 = arith.constant 0 : index
    %180 = arith.index_cast %179 : i32 to index
    %c0_60 = arith.constant 0 : index
    %181 = vector.load %arg6[%c0_59, %180, %c0_60] : memref<4x18x18xf32, #tpu.memory_space<vmem>>, vector<4x8x16xf32>
    %182 = vector.shape_cast %181 : vector<4x8x16xf32> to vector<4x128xf32>
    %c2_i32_61 = arith.constant 2 : i32
    %183 = arith.addi %154, %c2_i32_61 : i32
    %c0_62 = arith.constant 0 : index
    %184 = arith.index_cast %183 : i32 to index
    %c1_63 = arith.constant 1 : index
    %185 = vector.load %arg6[%c0_62, %184, %c1_63] : memref<4x18x18xf32, #tpu.memory_space<vmem>>, vector<4x8x16xf32>
    %186 = vector.shape_cast %185 : vector<4x8x16xf32> to vector<4x128xf32>
    %c2_i32_64 = arith.constant 2 : i32
    %187 = arith.addi %154, %c2_i32_64 : i32
    %c0_65 = arith.constant 0 : index
    %188 = arith.index_cast %187 : i32 to index
    %c2_66 = arith.constant 2 : index
    %189 = vector.load %arg6[%c0_65, %188, %c2_66] : memref<4x18x18xf32, #tpu.memory_space<vmem>>, vector<4x8x16xf32>
    %190 = vector.shape_cast %189 : vector<4x8x16xf32> to vector<4x128xf32>
    %191 = tpu.concatenate %158, %162, %166, %170, %174, %178, %182, %186, %190 in 0 : vector<4x128xf32>, vector<4x128xf32>, vector<4x128xf32>, vector<4x128xf32>, vector<4x128xf32>, vector<4x128xf32>, vector<4x128xf32>, vector<4x128xf32>, vector<4x128xf32> -> vector<36x128xf32>
    %192 = arith.truncf %191 : vector<36x128xf32> to vector<36x128xbf16>
    %cst_67 = arith.constant dense<0.000000e+00> : vector<8x128xf32>
    %193 = tpu.matmul %152, %192, %cst_67 {dimension_numbers = #tpu.dot_dimension_numbers<[1], [0], [0], [1], [0, 0, 1, 1], [], []>} : vector<8x36xbf16>, vector<36x128xbf16>, vector<8x128xf32> -> vector<8x128xf32>
    %c0_68 = arith.constant 0 : index
    %c0_69 = arith.constant 0 : index
    %194 = vector.load %arg4[%c0_68, %c0_69] : memref<8x1xf32, #tpu.memory_space<vmem>>, vector<8x1xf32>
    %cst_70 = arith.constant 8.000000e+00 : f32
    %195 = vector.broadcast %cst_70 : f32 to vector<8x1xf32>
    %196 = arith.mulf %194, %195 : vector<8x1xf32>
    %cst_71 = arith.constant 0.000000e+00 : f32
    %197 = vector.broadcast %cst_71 : f32 to vector<8x1xf32>
    %198 = arith.subf %196, %197 : vector<8x1xf32>
    %199 = math.absf %198 : vector<8x1xf32>
    %cst_72 = arith.constant 8.000000e+00 : f32
    %200 = vector.broadcast %cst_72 : f32 to vector<8x1xf32>
    %201 = arith.subf %200, %199 : vector<8x1xf32>
    %202 = arith.minimumf %199, %201 : vector<8x1xf32>
    %cst_73 = arith.constant 5.000000e-01 : f32
    %203 = vector.broadcast %cst_73 : f32 to vector<8x1xf32>
    %204 = arith.divf %202, %203 : vector<8x1xf32>
    %205 = arith.mulf %204, %204 : vector<8x1xf32>
    %cst_74 = arith.constant -5.000000e-01 : f32
    %206 = vector.broadcast %cst_74 : f32 to vector<8x1xf32>
    %207 = arith.mulf %206, %205 : vector<8x1xf32>
    %cst_75 = arith.constant 1.000000e+00 : f32
    %208 = vector.broadcast %cst_75 : f32 to vector<8x1xf32>
    %209 = arith.subf %196, %208 : vector<8x1xf32>
    %210 = math.absf %209 : vector<8x1xf32>
    %cst_76 = arith.constant 8.000000e+00 : f32
    %211 = vector.broadcast %cst_76 : f32 to vector<8x1xf32>
    %212 = arith.subf %211, %210 : vector<8x1xf32>
    %213 = arith.minimumf %210, %212 : vector<8x1xf32>
    %cst_77 = arith.constant 5.000000e-01 : f32
    %214 = vector.broadcast %cst_77 : f32 to vector<8x1xf32>
    %215 = arith.divf %213, %214 : vector<8x1xf32>
    %216 = arith.mulf %215, %215 : vector<8x1xf32>
    %cst_78 = arith.constant -5.000000e-01 : f32
    %217 = vector.broadcast %cst_78 : f32 to vector<8x1xf32>
    %218 = arith.mulf %217, %216 : vector<8x1xf32>
    %cst_79 = arith.constant 2.000000e+00 : f32
    %219 = vector.broadcast %cst_79 : f32 to vector<8x1xf32>
    %220 = arith.subf %196, %219 : vector<8x1xf32>
    %221 = math.absf %220 : vector<8x1xf32>
    %cst_80 = arith.constant 8.000000e+00 : f32
    %222 = vector.broadcast %cst_80 : f32 to vector<8x1xf32>
    %223 = arith.subf %222, %221 : vector<8x1xf32>
    %224 = arith.minimumf %221, %223 : vector<8x1xf32>
    %cst_81 = arith.constant 5.000000e-01 : f32
    %225 = vector.broadcast %cst_81 : f32 to vector<8x1xf32>
    %226 = arith.divf %224, %225 : vector<8x1xf32>
    %227 = arith.mulf %226, %226 : vector<8x1xf32>
    %cst_82 = arith.constant -5.000000e-01 : f32
    %228 = vector.broadcast %cst_82 : f32 to vector<8x1xf32>
    %229 = arith.mulf %228, %227 : vector<8x1xf32>
    %cst_83 = arith.constant 3.000000e+00 : f32
    %230 = vector.broadcast %cst_83 : f32 to vector<8x1xf32>
    %231 = arith.subf %196, %230 : vector<8x1xf32>
    %232 = math.absf %231 : vector<8x1xf32>
    %cst_84 = arith.constant 8.000000e+00 : f32
    %233 = vector.broadcast %cst_84 : f32 to vector<8x1xf32>
    %234 = arith.subf %233, %232 : vector<8x1xf32>
    %235 = arith.minimumf %232, %234 : vector<8x1xf32>
    %cst_85 = arith.constant 5.000000e-01 : f32
    %236 = vector.broadcast %cst_85 : f32 to vector<8x1xf32>
    %237 = arith.divf %235, %236 : vector<8x1xf32>
    %238 = arith.mulf %237, %237 : vector<8x1xf32>
    %cst_86 = arith.constant -5.000000e-01 : f32
    %239 = vector.broadcast %cst_86 : f32 to vector<8x1xf32>
    %240 = arith.mulf %239, %238 : vector<8x1xf32>
    %cst_87 = arith.constant 4.000000e+00 : f32
    %241 = vector.broadcast %cst_87 : f32 to vector<8x1xf32>
    %242 = arith.subf %196, %241 : vector<8x1xf32>
    %243 = math.absf %242 : vector<8x1xf32>
    %cst_88 = arith.constant 8.000000e+00 : f32
    %244 = vector.broadcast %cst_88 : f32 to vector<8x1xf32>
    %245 = arith.subf %244, %243 : vector<8x1xf32>
    %246 = arith.minimumf %243, %245 : vector<8x1xf32>
    %cst_89 = arith.constant 5.000000e-01 : f32
    %247 = vector.broadcast %cst_89 : f32 to vector<8x1xf32>
    %248 = arith.divf %246, %247 : vector<8x1xf32>
    %249 = arith.mulf %248, %248 : vector<8x1xf32>
    %cst_90 = arith.constant -5.000000e-01 : f32
    %250 = vector.broadcast %cst_90 : f32 to vector<8x1xf32>
    %251 = arith.mulf %250, %249 : vector<8x1xf32>
    %cst_91 = arith.constant 5.000000e+00 : f32
    %252 = vector.broadcast %cst_91 : f32 to vector<8x1xf32>
    %253 = arith.subf %196, %252 : vector<8x1xf32>
    %254 = math.absf %253 : vector<8x1xf32>
    %cst_92 = arith.constant 8.000000e+00 : f32
    %255 = vector.broadcast %cst_92 : f32 to vector<8x1xf32>
    %256 = arith.subf %255, %254 : vector<8x1xf32>
    %257 = arith.minimumf %254, %256 : vector<8x1xf32>
    %cst_93 = arith.constant 5.000000e-01 : f32
    %258 = vector.broadcast %cst_93 : f32 to vector<8x1xf32>
    %259 = arith.divf %257, %258 : vector<8x1xf32>
    %260 = arith.mulf %259, %259 : vector<8x1xf32>
    %cst_94 = arith.constant -5.000000e-01 : f32
    %261 = vector.broadcast %cst_94 : f32 to vector<8x1xf32>
    %262 = arith.mulf %261, %260 : vector<8x1xf32>
    %cst_95 = arith.constant 6.000000e+00 : f32
    %263 = vector.broadcast %cst_95 : f32 to vector<8x1xf32>
    %264 = arith.subf %196, %263 : vector<8x1xf32>
    %265 = math.absf %264 : vector<8x1xf32>
    %cst_96 = arith.constant 8.000000e+00 : f32
    %266 = vector.broadcast %cst_96 : f32 to vector<8x1xf32>
    %267 = arith.subf %266, %265 : vector<8x1xf32>
    %268 = arith.minimumf %265, %267 : vector<8x1xf32>
    %cst_97 = arith.constant 5.000000e-01 : f32
    %269 = vector.broadcast %cst_97 : f32 to vector<8x1xf32>
    %270 = arith.divf %268, %269 : vector<8x1xf32>
    %271 = arith.mulf %270, %270 : vector<8x1xf32>
    %cst_98 = arith.constant -5.000000e-01 : f32
    %272 = vector.broadcast %cst_98 : f32 to vector<8x1xf32>
    %273 = arith.mulf %272, %271 : vector<8x1xf32>
    %cst_99 = arith.constant 7.000000e+00 : f32
    %274 = vector.broadcast %cst_99 : f32 to vector<8x1xf32>
    %275 = arith.subf %196, %274 : vector<8x1xf32>
    %276 = math.absf %275 : vector<8x1xf32>
    %cst_100 = arith.constant 8.000000e+00 : f32
    %277 = vector.broadcast %cst_100 : f32 to vector<8x1xf32>
    %278 = arith.subf %277, %276 : vector<8x1xf32>
    %279 = arith.minimumf %276, %278 : vector<8x1xf32>
    %cst_101 = arith.constant 5.000000e-01 : f32
    %280 = vector.broadcast %cst_101 : f32 to vector<8x1xf32>
    %281 = arith.divf %279, %280 : vector<8x1xf32>
    %282 = arith.mulf %281, %281 : vector<8x1xf32>
    %cst_102 = arith.constant -5.000000e-01 : f32
    %283 = vector.broadcast %cst_102 : f32 to vector<8x1xf32>
    %284 = arith.mulf %283, %282 : vector<8x1xf32>
    %285 = arith.maximumf %207, %218 : vector<8x1xf32>
    %286 = arith.maximumf %285, %229 : vector<8x1xf32>
    %287 = arith.maximumf %286, %240 : vector<8x1xf32>
    %288 = arith.maximumf %287, %251 : vector<8x1xf32>
    %289 = arith.maximumf %288, %262 : vector<8x1xf32>
    %290 = arith.maximumf %289, %273 : vector<8x1xf32>
    %291 = arith.maximumf %290, %284 : vector<8x1xf32>
    %cst_103 = arith.constant 0.000000e+00 : f32
    %292 = vector.broadcast %cst_103 : f32 to vector<8x1xf32>
    %cst_104 = arith.constant 0.000000e+00 : f32
    %293 = vector.broadcast %cst_104 : f32 to vector<8x1xf32>
    %294 = arith.subf %207, %291 : vector<8x1xf32>
    %295 = math.exp %294 : vector<8x1xf32>
    %296 = arith.addf %293, %295 : vector<8x1xf32>
    %cst_105 = arith.constant -1.000000e+00 : f32
    %297 = vector.broadcast %cst_105 : f32 to vector<8x1xf32>
    %298 = arith.mulf %295, %297 : vector<8x1xf32>
    %299 = arith.addf %292, %298 : vector<8x1xf32>
    %300 = arith.subf %218, %291 : vector<8x1xf32>
    %301 = math.exp %300 : vector<8x1xf32>
    %302 = arith.addf %296, %301 : vector<8x1xf32>
    %cst_106 = arith.constant -0.428571463 : f32
    %303 = vector.broadcast %cst_106 : f32 to vector<8x1xf32>
    %304 = arith.mulf %301, %303 : vector<8x1xf32>
    %305 = arith.addf %299, %304 : vector<8x1xf32>
    %306 = arith.subf %229, %291 : vector<8x1xf32>
    %307 = math.exp %306 : vector<8x1xf32>
    %308 = arith.addf %302, %307 : vector<8x1xf32>
    %cst_107 = arith.constant 0.142857075 : f32
    %309 = vector.broadcast %cst_107 : f32 to vector<8x1xf32>
    %310 = arith.mulf %307, %309 : vector<8x1xf32>
    %311 = arith.addf %305, %310 : vector<8x1xf32>
    %312 = arith.subf %240, %291 : vector<8x1xf32>
    %313 = math.exp %312 : vector<8x1xf32>
    %314 = arith.addf %308, %313 : vector<8x1xf32>
    %cst_108 = arith.constant 0.714285612 : f32
    %315 = vector.broadcast %cst_108 : f32 to vector<8x1xf32>
    %316 = arith.mulf %313, %315 : vector<8x1xf32>
    %317 = arith.addf %311, %316 : vector<8x1xf32>
    %318 = arith.subf %251, %291 : vector<8x1xf32>
    %319 = math.exp %318 : vector<8x1xf32>
    %320 = arith.addf %314, %319 : vector<8x1xf32>
    %cst_109 = arith.constant 0.714285851 : f32
    %321 = vector.broadcast %cst_109 : f32 to vector<8x1xf32>
    %322 = arith.mulf %319, %321 : vector<8x1xf32>
    %323 = arith.addf %317, %322 : vector<8x1xf32>
    %324 = arith.subf %262, %291 : vector<8x1xf32>
    %325 = math.exp %324 : vector<8x1xf32>
    %326 = arith.addf %320, %325 : vector<8x1xf32>
    %cst_110 = arith.constant 0.142857313 : f32
    %327 = vector.broadcast %cst_110 : f32 to vector<8x1xf32>
    %328 = arith.mulf %325, %327 : vector<8x1xf32>
    %329 = arith.addf %323, %328 : vector<8x1xf32>
    %330 = arith.subf %273, %291 : vector<8x1xf32>
    %331 = math.exp %330 : vector<8x1xf32>
    %332 = arith.addf %326, %331 : vector<8x1xf32>
    %cst_111 = arith.constant -0.428571224 : f32
    %333 = vector.broadcast %cst_111 : f32 to vector<8x1xf32>
    %334 = arith.mulf %331, %333 : vector<8x1xf32>
    %335 = arith.addf %329, %334 : vector<8x1xf32>
    %336 = arith.subf %284, %291 : vector<8x1xf32>
    %337 = math.exp %336 : vector<8x1xf32>
    %338 = arith.addf %332, %337 : vector<8x1xf32>
    %cst_112 = arith.constant -1.000000e+00 : f32
    %339 = vector.broadcast %cst_112 : f32 to vector<8x1xf32>
    %340 = arith.mulf %337, %339 : vector<8x1xf32>
    %341 = arith.addf %335, %340 : vector<8x1xf32>
    %342 = arith.divf %341, %338 : vector<8x1xf32>
    %343 = vector.broadcast %342 : vector<8x1xf32> to vector<8x128xf32>
    %344 = arith.addf %193, %343 : vector<8x128xf32>
    %c0_113 = arith.constant 0 : index
    %c0_114 = arith.constant 0 : index
    %c0_115 = arith.constant 0 : index
    %345 = vector.load %arg5[%c0_113, %c0_114, %c0_115] : memref<1x8x128xf32, #tpu.memory_space<vmem>>, vector<1x8x128xf32>
    %346 = vector.shape_cast %345 : vector<1x8x128xf32> to vector<8x128xf32>
    %347 = vector.shape_cast %344 : vector<8x128xf32> to vector<1x8x128xf32>
    tpu.vector_store %arg5[%c0_113, %c0_114, %c0_115], %347 {strides = array<i32>} : memref<1x8x128xf32, #tpu.memory_space<vmem>>, vector<1x8x128xf32>,
    return
  }
  func.func @transform_0(%arg0: i32, %arg1: i32) -> (i32, i32, i32, i32) {
    %c0_i32 = arith.constant 0 : i32
    %c0_i32_0 = arith.constant 0 : i32
    %c0_i32_1 = arith.constant 0 : i32
    %c0_i32_2 = arith.constant 0 : i32
    return %arg0, %c0_i32, %c0_i32_0, %c0_i32_1 : i32, i32, i32, i32
  }
  func.func @transform_1(%arg0: i32, %arg1: i32) -> (i32, i32) {
    %c0_i32 = arith.constant 0 : i32
    %c0_i32_0 = arith.constant 0 : i32
    %c0_i32_1 = arith.constant 0 : i32
    return %c0_i32, %c0_i32_0 : i32, i32
  }
  func.func @transform_2(%arg0: i32, %arg1: i32) -> (i32, i32) {
    %c0_i32 = arith.constant 0 : i32
    %c0_i32_0 = arith.constant 0 : i32
    %c0_i32_1 = arith.constant 0 : i32
    return %c0_i32, %c0_i32_0 : i32, i32
  }
  func.func @transform_3(%arg0: i32, %arg1: i32) -> (i32, i32, i32) {
    %c0_i32 = arith.constant 0 : i32
    %c0_i32_0 = arith.constant 0 : i32
    return %arg0, %c0_i32, %arg1 : i32, i32, i32
  }
}

</mosaic_0001>

<bundles_post_ra>
// kernel: tpu_custom_call.1
= control target key start
LH: loop header
LB: loop body
LE: loop exit
PB: predicated region body
PF: predicated region fallthrough
CT: control target
= control target key end

     0   :  { %8 = vsyncpa [#allocation4], 0  ;;  %s3192_s0 = inlined_call_operand.hbm [shape: f32[2,4,16,16], index: 0, kind: input, shape index: {}]   ;;  %s3193_s1 = inlined_call_operand.vmem [shape: f32[8,36], index: 1, kind: input, shape index: {}]   ;;  %s3194_s2 = inlined_call_operand.vmem [shape: f32[8,1], index: 2, kind: input, shape index: {}]   ;;  %s3195_s3 = inlined_call_operand.hbm [shape: f32[2,8,256], index: 3, kind: output, shape index: {}]  }
   0x1   :  { %10 = vsyncpa [#allocation4 + $0x1], 0 }
   0x2   :  { %11 = vsyncpa [#allocation5], 0 }
   0x3   :  { %13 = vsyncpa [#allocation5 + $0x1], 0  ;;  %s2279_s12 = smov 0   ;;  %s2281_s13 = smov 0  }
   0x4   :  { %s2283_s14 = smov 0   ;;  %s2285_s15 = smov 0  }
   0x5   :  { %s2287_s16 = smov 0   ;;  %s2289_s17 = smov 0  }
   0x6   :  { %s2291_s18 = smov 0   ;;  %s2293_s19 = smov 0  }
   0x7   :  { %s2295_s20 = smov 0   ;;  %s2297_s21 = smov 0  }
   0x8   :  { %s2299_s22 = smov 0  }
   0x9 LB: > { %s1718_s23 = sadd.s32 4294967295, %s2237_s22   ;;  %s1719_s24 = sadd.s32 4294967294, %s2237_s22   ;;  %s2237_s22 = sphi %s2299_s22, %s19_s22   ;;  %s2233_s21 = sphi %s2297_s21, %s3217_s21   ;;  %s2229_s20 = sphi %s2295_s20, %s3216_s20   ;;  %s2225_s19 = sphi %s2293_s19, %s3215_s19   ;;  %s2221_s18 = sphi %s2291_s18, %s3214_s18   ;;  %s2217_s17 = sphi %s2289_s17, %s3213_s17   ;;  %s2213_s16 = sphi %s2287_s16, %s3212_s16   ;;  %s2209_s15 = sphi %s2285_s15, %s3211_s15   ;;  %s2205_s14 = sphi %s2283_s14, %s3210_s14   ;;  %s2201_s13 = sphi %s2281_s13, %s3209_s13   ;;  %s2197_s12 = sphi %s2279_s12, %s3208_s12  }
   0xa   : > { %s28_s25 = sadd.s32 1, %s2229_s20  ;;  %s31_s26 = sadd.s32 1, %s2233_s21 }
   0xb   : > { %p29_p0 = scmp.ge.s32.totalorder %s28_s25, 2  ;;  %s38_s27 = sadd.s32 1, %s2217_s17 }
   0xc   : > { %p45_p1 = scmp.ne.s32.totalorder %s2217_s17, %s2213_s16  ;;  %p46_p2 = scmp.eq.s32.totalorder %s2237_s22, 0 }
   0xd   : > { %s3219_s25 = smov (%p29_p0, %s28_s25), 0  ;;  %s3221_s26 = smov (!%p29_p0, %s31_s26), %s2233_s21 }
   0xe   : > { %p2343_p3 = por %p46_p2, %p45_p1  ;;  %p51_p4 = scmp.ne.s32.totalorder %s2213_s16, %s2209_s15 }
   0xf   : > { %p33_p5 = scmp.ge.s32.totalorder %s3221_s26, 2  ;;  %p52_p6 = scmp.eq.s32.totalorder %s1718_s23, 0 }
  0x10   : > { %s104_s29 = ssub.s32 %s2229_s20, %s3219_s25  ;;  %s108_s30 = sadd.s32 1, %s2205_s14 }
  0x11   : > { %s3223_s26 = smov (%p33_p5, %s3221_s26), 0  ;;  %p2353_p7 = por %p52_p6, %p51_p4 }
  0x12   : > { %3199 = sst [smem:[#allocation9_spill]] %s3223_s26  ;;  %p118_p8 = scmp.ne.s32.totalorder %s2205_s14, %s2201_s13 }
  0x13   : > { %s35_s5 = ssub.s32 %s2233_s21, %s3223_s26  ;;  %p119_p9 = scmp.eq.s32.totalorder %s1718_s23, 3 }
  0x14   : > { %p36_p10 = scmp.eq.s32.totalorder %s35_s5, 0  ;;  %s105_s6 = sor.u32 %s104_s29, %s35_s5 }
  0x15   : > { %p106_p11 = scmp.eq.s32.totalorder %s105_s6, 0  ;;  %p2361_p12 = por %p119_p9, %p118_p8 }
  0x16   : > { %s2366_s8 = scalar_select %p36_p10, %s2217_s17, %s38_s27  }
  0x17   : > { %s3201_s7 = scalar_select %p2361_p12, 1, 0 }
  0x18   : > { %s2369_s9 = scalar_select %p106_p11, %s2205_s14, %s108_s30  }
  0x19   : > { %p124_p13 = scmp.ne.s32.totalorder %s2201_s13, %s2197_s12  ;;  %p125_p0 = scmp.eq.s32.totalorder %s1719_s24, 3 }
  0x1a   : > { %p1787_p1 = scmp.lt.s32.totalorder %s2237_s22, 4  ;;  %s151_s11 = sand.u32 1, %s2217_s17  }
  0x1b   : > { %p2374_p2 = por %p125_p0, %p124_p13  ;;  %s1722_s15 = sshll.u32 %s151_s11, 6 }
  0x1c   : > { %s1760_s23 = sshll.u32 %s2233_s21, 10  ;;  %s155_s27 = scalar_lea.vmem [#allocation3], %s1722_s15 }
  0x1d   : > { %s3202_s10 = scalar_select %p2374_p2, 1, 0 }
  0x1e   : > { %s2383_s6 = scalar_lea.hbm %s3192_s0, %s1760_s23  ;;  %s162_s30 = sshll.u32 %s155_s27, 4  ;;  %s2385_s30 = int_to_ptr.vmem [resolvable:$true] %s162_s30 }
  0x1f   : > { %p2389_p4 = pnand %p1787_p1, %p2343_p3  ;;  %s2394_s26 = scalar_lea.sflag [#allocation4], %s151_s11 }
  0x20   : > { %s2085_s23 = scalar_lea.hbm %s2383_s6, 1024  ;;  %s2090_s28 = scalar_lea.hbm %s3192_s0, 2048 }
  0x21   : > { %p2086_p6 = scmp.ne.s32.totalorder %s2383_s6, %s2085_s23  ;;  %p2087_p8 = pneg %p2389_p4 }
  0x22   : > { %p2091_p3 = scmp.lt.u32.totalorder %s2383_s6, %s3192_s0  ;;  %p2092_p11 = scmp.lt.u32.totalorder %s2090_s28, %s2085_s23 }
  0x23   : > { %p2088_p9 = pnand %p2087_p8, %p2086_p6  ;;  %p2094_p0 = scmp.lt.u32.totalorder %s2085_s23, %s2383_s6 }
  0x24   : > { %p2093_p13 = por %p2092_p11, %p2091_p3 }
  0x25   : > { %p2089_p10 = pneg %p2088_p9 }
  0x26   : > { %p2095_p1 = por %p2094_p0, %p2093_p13 }
  0x28   : > { %p2096_p5 = pnand %p2095_p1, %p2089_p10 }
  0x2a   : > { %2099 = shalt.err (!%p2096_p5)
}
  0x2b   : > { %s2100_s11 = scalar_lea.vmem %s2385_s30, 1024  ;;  %s2239_s15 = smov [#allocation3]  }
  0x2c   : > { %p2101_p6 = scmp.ne.s32.totalorder %s2385_s30, %s2100_s11  ;;  %s2105_s29 = sshll.u32 %s2239_s15, 4  ;;  %s2106_s29 = int_to_ptr.vmem [resolvable:$false] %s2105_s29 }
  0x2d   : > { %s2107_s5 = scalar_lea.vmem %s2106_s29, 2048  ;;  %p2108_p12 = scmp.lt.s32.totalorder %s2385_s30, %s2106_s29 }
  0x2e   : > { %p2103_p9 = pnand %p2101_p6, %p2087_p8  ;;  %p2109_p3 = scmp.lt.s32.totalorder %s2107_s5, %s2100_s11 }
  0x30   : > { %p2104_p2 = pneg %p2103_p9  ;;  %p2110_p11 = por %p2109_p3, %p2108_p12 }
  0x32   : > { %p2111_p13 = pnand %p2110_p11, %p2104_p2 }
  0x34   : > { %2114 = shalt.err (!%p2111_p13)
}
  0x35   : > { %s2240_s23 = smov 128   ;;  %s2241_s28 = smov 8  }
  0x36   : > { %1782 = dma.hbm_to_vmem [thread:$0]  (!%p2389_p4), %s2383_s6, 1024, %s2385_s30, %s2394_s26, %s2240_s23, %s2240_s23, %s2241_s28  }
  0x37   : > { %p170_p5 = scmp.lt.s32.totalorder %s2237_s22, 5  ;;  %p3204_p8 = scmp.ge.s32.totalorder %s2237_s22, 1 }
  0x39   : > { %p171_p10 = pnand %p3204_p8, %p170_p5 }
  0x3a   : > { %s176_s27 = sand.u32 (!%p171_p10), 1, %s2213_s16  }
  0x3b   : > { %174 = sbr.rel (%p171_p10) target bundleno = 769 (0x301), region = 32  ;;  %s1726_s11 = sshll.u32 (!%p171_p10), %s176_s27, 6 }
  0x3c   : > { %s177_s15 = scalar_lea.sflag (!%p171_p10), [#allocation4], %s176_s27  ;;  %s2426_s29 = scalar_lea.vmem (!%p171_p10), [#allocation3], %s1726_s11 }
  0x42   : > { %2188 = dma.done.wait (%p2353_p7), %s177_s15, 1024  }
  0x43   : > { %2190 = vsyncadd (%p2353_p7), %s177_s15, 4294966272  ;;  %s200_s24 = sand.u32 1, %s2201_s13   ;;  %p1728_p12 = scmp.ne.s32.totalorder %s2221_s18, 0 }
  0x44   : > { %s2435_s26 = sshll.u32 %s200_s24, 3  ;;  %v224_v0 = vld [vmem:[%s2426_s29 + $0x10] sm:$0xff] (!%p1728_p12)  ;;  %v222_v1 = vld [vmem:[%s2426_s29] sm:$0xff] (!%p1728_p12)  ;;  %vm208_vm0 = vcmask (!%p1728_p12), 146432   ;;  %s2242_s4 = smov (!%p1728_p12), 1   ;;  %vm211_vm1 = vcmask (!%p1728_p12), 140288  }
  0x45   : > { %s202_s6 = scalar_lea.vmem [#allocation6], %s2435_s26  ;;  %207 = sbr.rel (%p1728_p12) target bundleno = 197 (0xc5), region = 40  ;;  %242 = vrot.lane.b32.xlu1 (!%p1728_p12), %v224_v0, %s2242_s4  ;;  %238 = vrot.lane.b32.xlu0 (!%p1728_p12), %v222_v1, %s2242_s4  ;;  %v225_v2 = vld [vmem:[%s2426_s29 + $0x18] sm:$0xff] (!%p1728_p12)  ;;  %v223_v3 = vld [vmem:[%s2426_s29 + $0x8] sm:$0xff] (!%p1728_p12)  ;;  %v2243_v4 = vmov (!%p1728_p12), 0.0   ;;  %vm262_vm2 = vcmask (!%p1728_p12), 138248  }
  0x46   : > { %213 = vst.msk [vmem:[#allocation2 + $0x18] sm:$0xff] (!%p1728_p12), %vm208_vm0, %v2243_v4  ;;  %214 = vst.msk [vmem:[#allocation2 + $0x20] sm:$0xff] (!%p1728_p12), %vm208_vm0, %v2243_v4  ;;  %v227_v5 = vld [vmem:[%s2426_s29 + $0x28] sm:$0xff] (!%p1728_p12)  ;;  %v226_v6 = vld [vmem:[%s2426_s29 + $0x20] sm:$0xff] (!%p1728_p12) }
  0x47   : > { %209 = vst.msk [vmem:[#allocation2] sm:$0xff] (!%p1728_p12), %vm208_vm0, %v2243_v4  ;;  %210 = vst.msk [vmem:[#allocation2 + $0x8] sm:$0xff] (!%p1728_p12), %vm208_vm0, %v2243_v4  ;;  %v229_v7 = vld [vmem:[%s2426_s29 + $0x38] sm:$0xff] (!%p1728_p12)  ;;  %v228_v8 = vld [vmem:[%s2426_s29 + $0x30] sm:$0xff] (!%p1728_p12) }
  0x48   : > { %216 = vst.msk [vmem:[#allocation2 + $0x30] sm:$0xff] (!%p1728_p12), %vm208_vm0, %v2243_v4  ;;  %217 = vst.msk [vmem:[#allocation2 + $0x38] sm:$0xff] (!%p1728_p12), %vm208_vm0, %v2243_v4 }
  0x49   : > { %219 = vst.msk [vmem:[#allocation2 + $0x48] sm:$0xff] (!%p1728_p12), %vm208_vm0, %v2243_v4  ;;  %220 = vst.msk [vmem:[#allocation2 + $0x50] sm:$0xff] (!%p1728_p12), %vm208_vm0, %v2243_v4  ;;  %244 = vrot.lane.b32.xlu1 (!%p1728_p12), %v225_v2, %s2242_s4  ;;  %240 = vrot.lane.b32.xlu0 (!%p1728_p12), %v223_v3, %s2242_s4 }
  0x4a   : > { %215 = vst.msk [vmem:[#allocation2 + $0x28] sm:$0x3] (!%p1728_p12), %vm211_vm1, %v2243_v4  ;;  %212 = vst.msk [vmem:[#allocation2 + $0x10] sm:$0x3] (!%p1728_p12), %vm211_vm1, %v2243_v4 }
  0x4b   : > { %218 = vst.msk [vmem:[#allocation2 + $0x40] sm:$0x3] (!%p1728_p12), %vm211_vm1, %v2243_v4  ;;  %221 = vst.msk [vmem:[#allocation2 + $0x58] sm:$0x3] (!%p1728_p12), %vm211_vm1, %v2243_v4 }
  0x4d   : > { %248 = vrot.lane.b32.xlu1 %v227_v5, %s2242_s4  ;;  %246 = vrot.lane.b32.xlu0 %v226_v6, %s2242_s4 }
  0x51   : > { %252 = vrot.lane.b32.xlu1 %v229_v7, %s2242_s4  ;;  %250 = vrot.lane.b32.xlu0 %v228_v8, %s2242_s4 }
  0xb7   : > { %v243_v9 = vpop.permute.xlu1 %242  ;;  %v239_v10 = vpop.permute.xlu0 %238 }
  0xb8   : > { %265 = vst.msk [vmem:[#allocation2 + $0x19] sm:$0xff] %vm262_vm2, %v243_v9  ;;  %263 = vst.msk [vmem:[#allocation2 + $0x1] sm:$0xff] %vm262_vm2, %v239_v10 }
  0xbb   : > { %v245_v11 = vpop.permute.xlu1 %244  ;;  %v241_v12 = vpop.permute.xlu0 %240 }
  0xbc   : > { %266 = vst.msk [vmem:[#allocation2 + $0x21] sm:$0xff] %vm262_vm2, %v245_v11  ;;  %264 = vst.msk [vmem:[#allocation2 + $0x9] sm:$0xff] %vm262_vm2, %v241_v12 }
  0xbf   : > { %v249_v13 = vpop.permute.xlu1 %248  ;;  %v247_v14 = vpop.permute.xlu0 %246 }
  0xc0   : > { %268 = vst.msk [vmem:[#allocation2 + $0x39] sm:$0xff] %vm262_vm2, %v249_v13  ;;  %267 = vst.msk [vmem:[#allocation2 + $0x31] sm:$0xff] %vm262_vm2, %v247_v14 }
  0xc3   : > { %v253_v15 = vpop.permute.xlu1 %252  ;;  %v251_v16 = vpop.permute.xlu0 %250 }
  0xc4   : > { %270 = vst.msk [vmem:[#allocation2 + $0x51] sm:$0xff] %vm262_vm2, %v253_v15  ;;  %269 = vst.msk [vmem:[#allocation2 + $0x49] sm:$0xff] %vm262_vm2, %v251_v16 }
  0xc5 PF: > { %s1736_s30 = sshll.u32 %s2221_s18, 3  ;;  %v398_v17 = vlaneseq  ;;  %v2244_v18 = vmov 1983009808   ;;  %s2245_s23 = smov 127   ;;  %v2246_v40 = vmov 0.0   ;;  %vm2256_vm3 = vmmov 0  }
  0xc6   : > { %v396_v19 = vunpack.c.l.s4 %v2244_v18  ;;  %s2456_s5 = scalar_lea.vmem [#allocation2], %s1736_s30  ;;  %1765 = vmatprep.subr.bf16.mxu0 %v2246_v40  ;;  %s2247_s28 = smov 126   ;;  %v2248_v8 = vmov 1934713408   ;;  %1771 = vmatprep.mubr.msk.bf16.mxu0 %vm2256_vm3, %v2246_v40  ;;  %vm489_vm4 = vcmask 130048   ;;  %vm491_vm5 = vcmask 261120  }
  0xc7   : > { %v2460_v22 = vshrl.u32 %v398_v17, 7  ;;  %v428_v9 = vunpack.c.l.s4 %v2248_v8  ;;  %s2249_s27 = smov 32   ;;  %s2250_s11 = smov 64   ;;  %vm493_vm6 = vcmask 392192   ;;  %vm495_vm7 = vcmask 523264  }
  0xc8   : > { %v397_v24 = vunpack.c.0.s8 %v396_v19  ;;  %s2251_s15 = smov 96   ;;  %s2252_s29 = smov 16   ;;  %vm497_vm8 = vcmask 654336   ;;  %vm499_vm9 = vcmask 785408   ;;  %vm501_vm10 = vcmask 916480  }
  0xc9   : > { %v429_v12 = vunpack.c.0.s8 %v428_v9  ;;  %vm1435_vm11 = vcmask 1043456   ;;  %vm1566_vm12 = vcmask 1041408   ;;  %vm1562_vm13 = vcmask 293888   ;;  %s1627_s30 = sshll.u32 %s202_s6, 4  ;;  %p3205_p2 = scmp.ne.s32.totalorder %s3201_s7, 0  ;;  %s3128_s30 = int_to_ptr.vmem [resolvable:$true] %s1627_s30 }
  0xca   : > { %v2471_v34 = vsub.s32 %v397_v24, %v2460_v22 }
  0xcb   : > { %v391_v20 = vld [vmem:[%s2456_s5 + $0x30] sm:$0xff]  ;;  %v389_v21 = vld [vmem:[%s2456_s5] sm:$0xff]  ;;  %v392_v23 = vld [vmem:[%s2456_s5 + $0x48] sm:$0xff]  ;;  %v2561_v17 = vsub.s32 %v429_v12, %v2460_v22 }
  0xcc   : > { %511 = vrot.lane.b32.xlu1 %v391_v20, %s2245_s23  ;;  %507 = vrot.lane.b32.xlu0 %v389_v21, %s2245_s23  ;;  %v393_v25 = vcombine.low %v389_v21, %v391_v20  ;;  %v394_v26 = vcombine.high %v389_v21, %v391_v20  ;;  %v390_v27 = vld [vmem:[%s2456_s5 + $0x18] sm:$0xff]  ;;  %v1738_v31 = vld [vmem:[%s2456_s5 + $0x1] sm:$0xff] }
  0xcd   : > { %v1739_v28 = vld [vmem:[%s2456_s5 + $0x19] sm:$0xff]  ;;  %v409_v29 = vcombine.low %v390_v27, %v392_v23  ;;  %v410_v30 = vcombine.high %v390_v27, %v392_v23  ;;  %v1741_v32 = vld [vmem:[%s2456_s5 + $0x49] sm:$0xff]  ;;  %v1740_v33 = vld [vmem:[%s2456_s5 + $0x31] sm:$0xff] }
  0xce   : > { %v759_v35 = vcombine.low %v1739_v28, %v1741_v32  ;;  %v760_v36 = vcombine.high %v1739_v28, %v1741_v32  ;;  %v743_v37 = vcombine.low %v1738_v31, %v1740_v33  ;;  %v1744_v38 = vld [vmem:[%s2456_s5 + $0x1a] sm:$0xff]  ;;  %v1746_v39 = vld [vmem:[%s2456_s5 + $0x4a] sm:$0xff]  ;;  %v744_v41 = vcombine.high %v1738_v31, %v1740_v33  ;;  %v1743_v52 = vld [vmem:[%s2456_s5 + $0x2] sm:$0xff] }
  0xcf   : > { %v1102_v42 = vcombine.low %v1744_v38, %v1746_v39  ;;  %v1103_v43 = vcombine.high %v1744_v38, %v1746_v39  ;;  %v2477_v44 = vrot.slane %v393_v25, %v2471_v34  ;;  %v2480_v45 = vrot.slane %v394_v26, %v2471_v34  ;;  %v1745_v53 = vld [vmem:[%s2456_s5 + $0x32] sm:$0xff]  ;;  %s2253_s5 = smov 48  }
  0xd0   : > { %513 = vrot.lane.b32.xlu1 %v392_v23, %s2245_s23  ;;  %v2484_v46 = vrot.slane %v409_v29, %v2471_v34  ;;  %v2487_v47 = vrot.slane %v410_v30, %v2471_v34  ;;  %509 = vrot.lane.b32.xlu0 %v390_v27, %s2245_s23  ;;  %v2491_v48 = vrot.slane %v759_v35, %v2471_v34 }
  0xd1   : > { %v2494_v49 = vrot.slane %v760_v36, %v2471_v34  ;;  %v2497_v50 = vrot.slane %v743_v37, %v2471_v34  ;;  %v2500_v51 = vrot.slane %v744_v41, %v2471_v34  ;;  %v1086_v54 = vcombine.low %v1743_v52, %v1745_v53 }
  0xd2   : > { %v1087_v55 = vcombine.high %v1743_v52, %v1745_v53  ;;  %v441_v58 = vcombine.low %v2480_v45, %v2487_v47  ;;  %v426_v59 = vcombine.high %v2477_v44, %v2484_v46  ;;  %v442_v61 = vcombine.high %v2480_v45, %v2487_v47 }
  0xd3   : > { %v776_v56 = vcombine.high %v2497_v50, %v2491_v48  ;;  %v791_v57 = vcombine.low %v2500_v51, %v2494_v49  ;;  %v792_v60 = vcombine.high %v2500_v51, %v2494_v49  ;;  %v775_v62 = vcombine.low %v2497_v50, %v2491_v48 }
  0xd4   : > { %624 = vrot.lane.b32.xlu1 %v390_v27, %s2247_s28  ;;  %622 = vrot.lane.b32.xlu0 %v389_v21, %s2247_s28  ;;  %v425_v63 = vcombine.low %v2477_v44, %v2484_v46  ;;  %v2531_v0 = vrot.slane %v1102_v42, %v2471_v34  ;;  %v2534_v1 = vrot.slane %v1103_v43, %v2471_v34 }
  0xd5   : > { %v2537_v2 = vrot.slane %v1086_v54, %v2471_v34  ;;  %v2540_v3 = vrot.slane %v1087_v55, %v2471_v34  ;;  %v2574_v22 = vrot.slane %v776_v56, %v2561_v17  ;;  %v2580_v35 = vrot.slane %v791_v57, %v2561_v17 }
  0xd6   : > { %v2600_v55 = vrot.slane %v441_v58, %v2561_v17  ;;  %v2606_v56 = vrot.slane %v426_v59, %v2561_v17 }
  0xd7   : > { %v1119_v4 = vcombine.high %v2537_v2, %v2531_v0  ;;  %v1134_v5 = vcombine.low %v2540_v3, %v2534_v1  ;;  %v1135_v6 = vcombine.high %v2540_v3, %v2534_v1  ;;  %v1118_v7 = vcombine.low %v2537_v2, %v2531_v0 }
  0xd8   : > { %628 = vrot.lane.b32.xlu1 %v392_v23, %s2247_s28  ;;  %626 = vrot.lane.b32.xlu0 %v391_v20, %s2247_s28 }
  0xd9   : > { %v2756_v48 = vrot.slane %v1135_v6, %v2561_v17 }
  0xdc   : > { %967 = vrot.lane.b32.xlu1 %v1739_v28, %s2247_s28  ;;  %965 = vrot.lane.b32.xlu0 %v1738_v31, %s2247_s28 }
  0xe0   : > { %971 = vrot.lane.b32.xlu1 %v1741_v32, %s2247_s28  ;;  %969 = vrot.lane.b32.xlu0 %v1740_v33, %s2247_s28 }
  0xe4   : > { %1195 = vrot.lane.b32.xlu1 %v1744_v38, %s2245_s23  ;;  %1193 = vrot.lane.b32.xlu0 %v1743_v52, %s2245_s23 }
  0xe8   : > { %1199 = vrot.lane.b32.xlu1 %v1746_v39, %s2245_s23  ;;  %1197 = vrot.lane.b32.xlu0 %v1745_v53, %s2245_s23 }
  0xec   : > { %852 = vrot.lane.b32.xlu1 %v1739_v28, %s2245_s23  ;;  %850 = vrot.lane.b32.xlu0 %v1738_v31, %s2245_s23 }
  0xf0   : > { %856 = vrot.lane.b32.xlu1 %v1741_v32, %s2245_s23  ;;  %854 = vrot.lane.b32.xlu0 %v1740_v33, %s2245_s23  ;;  %s2254_s23 = smov 80  }
  0xf4   : > { %1310 = vrot.lane.b32.xlu1 %v1744_v38, %s2247_s28  ;;  %1308 = vrot.lane.b32.xlu0 %v1743_v52, %s2247_s28 }
  0xf8   : > { %1314 = vrot.lane.b32.xlu1 %v1746_v39, %s2247_s28  ;;  %1312 = vrot.lane.b32.xlu0 %v1745_v53, %s2247_s28  ;;  %s2255_s28 = smov 112  }
 0x13e   : > { %v512_v10 = vpop.permute.xlu1 %511  ;;  %v508_v11 = vpop.permute.xlu0 %507 }
 0x13f   : > { %v519_v13 = vcombine.low %v508_v11, %v512_v10  ;;  %v520_v14 = vcombine.high %v508_v11, %v512_v10 }
 0x141   : > { %v2564_v20 = vrot.slane %v519_v13, %v2471_v34  ;;  %v534_v21 = vrot.slane %v520_v14, %v2471_v34  ;;  %v2623_v13 = vrot.slane %v792_v60, %v2561_v17 }
 0x142   : > { %v514_v15 = vpop.permute.xlu1 %513  ;;  %v510_v16 = vpop.permute.xlu0 %509 }
 0x143   : > { %v535_v18 = vcombine.low %v510_v16, %v514_v15  ;;  %v536_v19 = vcombine.high %v510_v16, %v514_v15 }
 0x145   : > { %v2568_v23 = vrot.slane %v535_v18, %v2471_v34  ;;  %v550_v24 = vrot.slane %v536_v19, %v2471_v34 }
 0x146   : > { %v625_v25 = vpop.permute.xlu1 %624  ;;  %v623_v26 = vpop.permute.xlu0 %622 }
 0x147   : > { %v552_v27 = vcombine.high %v2564_v20, %v2568_v23  ;;  %v567_v28 = vcombine.low %v534_v21, %v550_v24  ;;  %v568_v57 = vcombine.high %v534_v21, %v550_v24 }
 0x149   : > { %v2577_v30 = vrot.slane %v552_v27, %v2561_v17  ;;  %v2585_v39 = vrot.slane %v567_v28, %v2561_v17  ;;  %v2630_v18 = vrot.slane %v568_v57, %v2561_v17 }
 0x14a   : > { %v629_v29 = vpop.permute.xlu1 %628  ;;  %v627_v33 = vpop.permute.xlu0 %626 }
 0x14b   : > { %v650_v31 = vcombine.low %v625_v25, %v629_v29  ;;  %v651_v32 = vcombine.high %v625_v25, %v629_v29  ;;  %v634_v36 = vcombine.low %v623_v26, %v627_v33  ;;  %v635_v37 = vcombine.high %v623_v26, %v627_v33 }
 0x14c   : > { %v1895_v38 = vpack.i.bf16 %v2574_v22, %v2577_v30  ;;  %v1905_v10 = vpack.i.bf16 %v2580_v35, %v2585_v39  ;;  %v1915_v60 = vpack.i.bf16 %v2623_v13, %v2630_v18  ;;  %v2640_v26 = vrot.slane %v442_v61, %v2561_v17 }
 0x14d   : > { %v2588_v41 = vrot.slane %v650_v31, %v2471_v34  ;;  %v665_v42 = vrot.slane %v651_v32, %v2471_v34  ;;  %v2592_v43 = vrot.slane %v634_v36, %v2471_v34  ;;  %v649_v52 = vrot.slane %v635_v37, %v2471_v34 }
 0x14e   : > { %1896 = vrot.lane.b32.xlu1 %v1895_v38, %s2249_s27  ;;  %v968_v53 = vpop.permute.xlu1 %967  ;;  %v966_v54 = vpop.permute.xlu0 %965 }
 0x14f   : > { %v667_v8 = vcombine.high %v2592_v43, %v2588_v41  ;;  %v682_v9 = vcombine.low %v649_v52, %v665_v42  ;;  %v683_v14 = vcombine.high %v649_v52, %v665_v42 }
 0x151   : > { %v2614_v58 = vrot.slane %v682_v9, %v2561_v17  ;;  %v2617_v12 = vrot.slane %v667_v8, %v2561_v17  ;;  %v2643_v27 = vrot.slane %v683_v14, %v2561_v17 }
 0x152   : > { %1906 = vrot.lane.b32.xlu1 %v1905_v10, %s2250_s11  ;;  %v972_v11 = vpop.permute.xlu1 %971  ;;  %v970_v59 = vpop.permute.xlu0 %969 }
 0x153   : > { %v1910_v15 = vpack.i.bf16 %v2614_v58, %v2600_v55  ;;  %v1900_v16 = vpack.i.bf16 %v2617_v12, %v2606_v56  ;;  %v993_v19 = vcombine.low %v968_v53, %v972_v11  ;;  %v994_v21 = vcombine.high %v968_v53, %v972_v11 }
 0x154   : > { %v977_v24 = vcombine.low %v966_v54, %v970_v59  ;;  %v978_v25 = vcombine.high %v966_v54, %v970_v59  ;;  %v1925_v38 = vpack.i.bf16 %v2643_v27, %v2640_v26 }
 0x155   : > { %1901 = vrot.lane.b32.xlu0 %v1900_v16, %s2249_s27  ;;  %v2646_v28 = vrot.slane %v993_v19, %v2471_v34  ;;  %v2649_v29 = vrot.slane %v994_v21, %v2471_v34 }
 0x156   : > { %1911 = vrot.lane.b32.xlu1 %v1910_v15, %s2250_s11  ;;  %v1196_v49 = vpop.permute.xlu1 %1195  ;;  %v1194_v51 = vpop.permute.xlu0 %1193  ;;  %v2652_v31 = vrot.slane %v977_v24, %v2471_v34  ;;  %v992_v32 = vrot.slane %v978_v25, %v2471_v34 }
 0x158   : > { %v1010_v53 = vcombine.high %v2652_v31, %v2646_v28  ;;  %v1025_v54 = vcombine.low %v992_v32, %v2649_v29 }
 0x159   : > { %1916 = vrot.lane.b32.xlu0 %v1915_v60, %s2251_s15 }
 0x15a   : > { %v1200_v45 = vpop.permute.xlu1 %1199  ;;  %v1198_v33 = vpop.permute.xlu0 %1197  ;;  %v2673_v15 = vrot.slane %v1010_v53, %v2561_v17  ;;  %v2679_v19 = vrot.slane %v1025_v54, %v2561_v17 }
 0x15b   : > { %v1221_v47 = vcombine.low %v1196_v49, %v1200_v45  ;;  %v1222_v61 = vcombine.high %v1196_v49, %v1200_v45  ;;  %v1205_v36 = vcombine.low %v1194_v51, %v1198_v33  ;;  %v1206_v37 = vcombine.high %v1194_v51, %v1198_v33 }
 0x15c   : > { %v1042_v0 = vcombine.high %v2673_v15, %v2246_v40 }
 0x15d   : > { %v2659_v42 = vrot.slane %v1221_v47, %v2471_v34  ;;  %v1236_v52 = vrot.slane %v1222_v61, %v2471_v34  ;;  %v2666_v57 = vrot.slane %v1205_v36, %v2471_v34  ;;  %v1220_v8 = vrot.slane %v1206_v37, %v2471_v34  ;;  %1926 = vrot.lane.b32.xlu0 %v1925_v38, %s2251_s15 }
 0x15e   : > { %v853_v9 = vpop.permute.xlu1 %852  ;;  %v851_v10 = vpop.permute.xlu0 %850 }
 0x15f   : > { %v1238_v11 = vcombine.high %v2666_v57, %v2659_v42  ;;  %v1253_v59 = vcombine.low %v1220_v8, %v1236_v52  ;;  %v1254_v53 = vcombine.high %v1220_v8, %v1236_v52  ;;  %v551_v52 = vcombine.low %v2564_v20, %v2568_v23 }
 0x160   : > { %v1237_v46 = vcombine.low %v2666_v57, %v2659_v42  ;;  %v584_v42 = vcombine.high %v2577_v30, %v2246_v40  ;;  %v808_v57 = vcombine.high %v2574_v22, %v2246_v40  ;;  %v699_v30 = vcombine.high %v2617_v12, %v2246_v40 }
 0x161   : > { %v2676_v16 = vrot.slane %v1238_v11, %v2561_v17  ;;  %v2682_v21 = vrot.slane %v1253_v59, %v2561_v17  ;;  %v2704_v11 = vrot.slane %v1119_v4, %v2561_v17  ;;  %v2710_v59 = vrot.slane %v1134_v5, %v2561_v17 }
 0x162   : > { %v857_v14 = vpop.permute.xlu1 %856  ;;  %v855_v49 = vpop.permute.xlu0 %854 }
 0x163   : > { %v878_v24 = vcombine.low %v853_v9, %v857_v14  ;;  %v879_v25 = vcombine.high %v853_v9, %v857_v14  ;;  %v862_v51 = vcombine.low %v851_v10, %v855_v49  ;;  %v863_v60 = vcombine.high %v851_v10, %v855_v49 }
 0x164   : > { %v1920_v45 = vpack.i.bf16 %v2676_v16, %v2673_v15  ;;  %v1935_v47 = vpack.i.bf16 %v2682_v21, %v2679_v19  ;;  %v1026_v14 = vcombine.high %v992_v32, %v2649_v29 }
 0x165   : > { %v2689_v61 = vrot.slane %v878_v24, %v2471_v34  ;;  %v893_v33 = vrot.slane %v879_v25, %v2471_v34  ;;  %v2693_v36 = vrot.slane %v862_v51, %v2471_v34  ;;  %v877_v37 = vrot.slane %v863_v60, %v2471_v34 }
 0x166   : > { %1921 = vrot.lane.b32.xlu1 %v1920_v45, %s2249_s27  ;;  %1936 = vrot.lane.b32.xlu0 %v1935_v47, %s2250_s11  ;;  %v1311_v38 = vpop.permute.xlu1 %1310  ;;  %v1309_v54 = vpop.permute.xlu0 %1308  ;;  %v2722_v45 = vrot.slane %v1254_v53, %v2561_v17  ;;  %v2732_v32 = vrot.slane %v1026_v14, %v2561_v17 }
 0x167   : > { %v895_v9 = vcombine.high %v2693_v36, %v2689_v61  ;;  %v910_v10 = vcombine.low %v877_v37, %v893_v33  ;;  %v911_v4 = vcombine.high %v877_v37, %v893_v33  ;;  %v2738_v33 = vrot.slane %v775_v62, %v2561_v17 }
 0x168   : > { %v2741_v37 = vrot.slane %v551_v52, %v2561_v17 }
 0x169   : > { %v2716_v24 = vrot.slane %v895_v9, %v2561_v17  ;;  %v2719_v25 = vrot.slane %v910_v10, %v2561_v17  ;;  %v2773_v9 = vrot.slane %v425_v63, %v2561_v17  ;;  %v807_v6 = vcombine.high %v2738_v33, %v2246_v40 }
 0x16a   : > { %v1315_v8 = vpop.permute.xlu1 %1314  ;;  %v1313_v60 = vpop.permute.xlu0 %1312  ;;  %v583_v3 = vcombine.high %v2741_v37, %v2246_v40 }
 0x16b   : > { %v1336_v49 = vcombine.low %v1311_v38, %v1315_v8  ;;  %v1337_v51 = vcombine.high %v1311_v38, %v1315_v8  ;;  %v1320_v5 = vcombine.low %v1309_v54, %v1313_v60  ;;  %v1321_v47 = vcombine.high %v1309_v54, %v1313_v60 }
 0x16c   : > { %v1930_v29 = vpack.i.bf16 %v2704_v11, %v2716_v24  ;;  %v1940_v20 = vpack.i.bf16 %v2710_v59, %v2719_v25  ;;  %v666_v38 = vcombine.low %v2592_v43, %v2588_v41  ;;  %v1945_v54 = vpack.i.bf16 %v2722_v45, %v2732_v32 }
 0x16d   : > { %v2729_v23 = vrot.slane %v1336_v49, %v2471_v34  ;;  %v2746_v53 = vrot.slane %v1320_v5, %v2471_v34  ;;  %v2759_v50 = vrot.slane %v1337_v51, %v2471_v34  ;;  %v2762_v62 = vrot.slane %v1321_v47, %v2471_v34  ;;  %v271_v49 = vld [vmem:[%s3193_s1] sm:$0xff] }
 0x16e   : > { %1931 = vrot.lane.b32.xlu1 %v1930_v29, %s2249_s27  ;;  %1941 = vrot.lane.b32.xlu0 %v1940_v20, %s2250_s11  ;;  %v2767_v43 = vrot.slane %v911_v4, %v2561_v17  ;;  %v2776_v1 = vrot.slane %v666_v38, %v2561_v17  ;;  %v1955_v63 = vpack.i.bf16 %v807_v6, %v583_v3  ;;  %v2821_v60 = vmul.f32 8.0, %v271_v49 }
 0x16f   : > { %v1353_v41 = vcombine.high %v2746_v53, %v2729_v23  ;;  %v1368_v10 = vcombine.low %v2762_v62, %v2759_v50  ;;  %v457_v14 = vcombine.high %v2773_v9, %v2246_v40  ;;  %v1009_v8 = vcombine.low %v2652_v31, %v2646_v28 }
 0x170   : > { %v1950_v44 = vpack.i.bf16 %v2756_v48, %v2767_v43  ;;  %v698_v52 = vcombine.high %v2776_v1, %v2246_v40  ;;  %v2813_v51 = vrot.slane %v1237_v46, %v2561_v17  ;;  %v458_v31 = vcombine.high %v2606_v56, %v2246_v40 }
 0x171   : > { %v2780_v34 = vrot.slane %v1353_v41, %v2561_v17  ;;  %v2803_v4 = vrot.slane %v1368_v10, %v2561_v17  ;;  %v2824_v22 = vrot.slane %v1009_v8, %v2561_v17  ;;  %v1965_v5 = vpack.i.bf16 %v808_v57, %v584_v42 }
 0x172   : > { %1946 = vrot.lane.b32.xlu1 %v1945_v54, %s2251_s15  ;;  %v1960_v28 = vpack.i.bf16 %v698_v52, %v457_v14  ;;  %v585_v47 = vcombine.high %v2585_v39, %v2246_v40  ;;  %v809_v29 = vcombine.high %v2580_v35, %v2246_v40  ;;  %v894_v56 = vcombine.low %v2693_v36, %v2689_v61 }
 0x173   : > { %1393 = vrot.lane.b32.xlu0 %v2780_v34, %s2249_s27  ;;  %v1970_v12 = vpack.i.bf16 %v699_v30, %v458_v31  ;;  %v1269_v20 = vcombine.high %v2813_v51, %v2246_v40  ;;  %v1729_v38 = vadd.f32 -1.0, %v2821_v60  ;;  %v1041_v39 = vcombine.high %v2824_v22, %v2246_v40  ;;  %s2258_s27 = smov [#allocation6]  }
 0x174   : > { %v1975_v54 = vpack.i.bf16 %v809_v29, %v585_v47  ;;  %v586_v35 = vcombine.high %v2630_v18, %v2246_v40  ;;  %v810_v61 = vcombine.high %v2623_v13, %v2246_v40  ;;  %v459_v36 = vcombine.high %v2600_v55, %v2246_v40 }
 0x175   : > { %v2847_v41 = vrot.slane %v894_v56, %v2561_v17  ;;  %v1980_v3 = vpack.i.bf16 %v1269_v20, %v1041_v39  ;;  %v700_v6 = vcombine.high %v2614_v58, %v2246_v40  ;;  %v2856_v18 = vrot.slane %v1118_v7, %v2561_v17 }
 0x176   : > { %1951 = vrot.lane.b32.xlu1 %v1950_v44, %s2251_s15  ;;  %v273_v13 = vand.u32 2147483647, %v2821_v60  ;;  %v281_v10 = vand.u32 2147483647, %v1729_v38  ;;  %v1990_v55 = vpack.i.bf16 %v810_v61, %v586_v35  ;;  %v1270_v44 = vcombine.high %v2676_v16, %v2246_v40 }
 0x177   : > { %1956 = vrot.lane.b32.xlu0 %v1955_v63, %s2252_s29  ;;  %v1730_v46 = vadd.f32 -2.0, %v2821_v60  ;;  %v1985_v58 = vpack.i.bf16 %v700_v6, %v459_v36  ;;  %v926_v2 = vcombine.high %v2847_v41, %v2246_v40  ;;  %v1150_v7 = vcombine.high %v2856_v18, %v2246_v40 }
 0x178   : > { %v460_v63 = vcombine.high %v2640_v26, %v2246_v40  ;;  %v274_v14 = vsub.f32 8.0, %v273_v13  ;;  %v282_v16 = vsub.f32 8.0, %v281_v10  ;;  %v2000_v52 = vpack.i.bf16 %v1270_v44, %v1042_v0 }
 0x179   : > { %v701_v8 = vcombine.high %v2643_v27, %v2246_v40  ;;  %v288_v42 = vand.u32 2147483647, %v1730_v46  ;;  %v1731_v15 = vadd.f32 -3.0, %v2821_v60  ;;  %v1995_v57 = vpack.i.bf16 %v1150_v7, %v926_v2 }
 0x17a   : > { %1401 = vrot.lane.b32.xlu1 %v2803_v4, %s2250_s11  ;;  %v927_v49 = vcombine.high %v2716_v24, %v2246_v40  ;;  %v1151_v26 = vcombine.high %v2704_v11, %v2246_v40  ;;  %v283_v31 = vmin.f32 %v281_v10, %v282_v16  ;;  %v1271_v27 = vcombine.high %v2682_v21, %v2246_v40  ;;  %s2119_s11 = sshll.u32 %s2258_s27, 4  ;;  %s2120_s11 = int_to_ptr.vmem [resolvable:$false] %s2119_s11 }
 0x17b   : > { %1961 = vrot.lane.b32.xlu0 %v1960_v28, %s2252_s29  ;;  %v275_v28 = vmin.f32 %v273_v13, %v274_v14  ;;  %v2005_v30 = vpack.i.bf16 %v701_v8, %v460_v63  ;;  %v295_v47 = vand.u32 2147483647, %v1731_v15  ;;  %v1043_v29 = vcombine.high %v2679_v19, %v2246_v40  ;;  %p2122_p1 = scmp.lt.s32.totalorder %s3128_s30, %s2120_s11 }
 0x17c   : > { %v1152_v56 = vcombine.high %v2710_v59, %v2246_v40  ;;  %v1352_v24 = vcombine.low %v2746_v53, %v2729_v23  ;;  %v2010_v11 = vpack.i.bf16 %v1151_v26, %v927_v49  ;;  %v1732_v20 = vadd.f32 -4.0, %v2821_v60  ;;  %v1443_v49 = vld [vmem:[%s3194_s2] sm:$0xff] }
 0x17d   : > { %v277_v21 = vmul.f32 2.0, %v275_v28  ;;  %v284_v38 = vmul.f32 2.0, %v283_v31  ;;  %v1272_v19 = vcombine.high %v2722_v45, %v2246_v40  ;;  %v296_v39 = vsub.f32 8.0, %v295_v47 }
 0x17e   : > { %1966 = vrot.lane.b32.xlu1 %v1965_v5, %s2253_s5  ;;  %v289_v5 = vsub.f32 8.0, %v288_v42  ;;  %v1044_v53 = vcombine.high %v2732_v32, %v2246_v40  ;;  %v302_v35 = vand.u32 2147483647, %v1732_v20  ;;  %v1153_v61 = vcombine.high %v2756_v48, %v2246_v40 }
 0x17f   : > { %1971 = vrot.lane.b32.xlu0 %v1970_v12, %s2253_s5  ;;  %v928_v12 = vcombine.high %v2719_v25, %v2246_v40  ;;  %v2901_v25 = vrot.slane %v1352_v24, %v2561_v17  ;;  %v278_v36 = vmul.f32 %v277_v21, %v277_v21  ;;  %v929_v6 = vcombine.high %v2767_v43, %v2246_v40 }
 0x180   : > { %v290_v59 = vmin.f32 %v288_v42, %v289_v5  ;;  %v2025_v45 = vpack.i.bf16 %v1272_v19, %v1044_v53  ;;  %v297_v10 = vmin.f32 %v295_v47, %v296_v39  ;;  %v1733_v44 = vadd.f32 -5.0, %v2821_v60 }
 0x181   : > { %v2020_v23 = vpack.i.bf16 %v1152_v56, %v928_v12  ;;  %v1384_v32 = vcombine.high %v2901_v25, %v2246_v40  ;;  %v1369_v48 = vcombine.high %v2762_v62, %v2759_v50  ;;  %v2914_v46 = vmul.f32 -0.5, %v278_v36 }
 0x182   : > { %1976 = vrot.lane.b32.xlu1 %v1975_v54, %s2254_s23  ;;  %v2015_v54 = vpack.i.bf16 %v1271_v27, %v1043_v29  ;;  %v291_v13 = vmul.f32 2.0, %v290_v59  ;;  %v1734_v0 = vadd.f32 -6.0, %v2821_v60  ;;  %v2030_v43 = vpack.i.bf16 %v1153_v61, %v929_v6 }
 0x183   : > { %1981 = vrot.lane.b32.xlu0 %v1980_v3, %s2252_s29  ;;  %v285_v3 = vmul.f32 %v284_v38, %v284_v38  ;;  %v298_v7 = vmul.f32 2.0, %v297_v10  ;;  %v1735_v63 = vadd.f32 -7.0, %v2821_v60  ;;  %v1385_v14 = vcombine.high %v2780_v34, %v2246_v40 }
 0x184   : > { %v292_v2 = vmul.f32 %v291_v13, %v291_v13  ;;  %v309_v50 = vand.u32 2147483647, %v1733_v44  ;;  %v1383_v62 = vrot.slane %v1369_v48, %v2561_v17  ;;  %v1386_v34 = vcombine.high %v2803_v4, %v2246_v40 }
 0x185   : > { %v299_v42 = vmul.f32 %v298_v7, %v298_v7  ;;  %v323_v15 = vand.u32 2147483647, %v1735_v63  ;;  %v2257_v28 = vmov 0   ;;  %v1444_v31 = vmul.f32 8.0, %v1443_v49 }
 0x186   : > { %1991 = vrot.lane.b32.xlu1 %v1990_v55, %s2255_s28  ;;  %v303_v55 = vsub.f32 8.0, %v302_v35  ;;  %v2927_v8 = vmul.f32 -0.5, %v292_v2  ;;  %v310_v17 = vsub.f32 8.0, %v309_v50  ;;  %2036 = vset.pattern.permute.xlu0 %v2257_v28 }
 0x187   : > { %1986 = vrot.lane.b32.xlu0 %v1985_v58, %s2254_s23  ;;  %v2916_v58 = vmul.f32 -0.5, %v285_v3  ;;  %2035 = vset.pattern.permute.xlu1 %v2257_v28  ;;  %v2939_v27 = vmul.f32 -0.5, %v299_v42  ;;  %v324_v5 = vsub.f32 8.0, %v323_v15  ;;  %v1445_v47 = vand.u32 2147483647, %v1444_v31 }
 0x188   : > { %v304_v16 = vmin.f32 %v302_v35, %v303_v55  ;;  %v1747_v29 = vadd.f32 -1.0, %v1444_v31  ;;  %v1748_v56 = vadd.f32 -2.0, %v1444_v31  ;;  %v1749_v24 = vadd.f32 -3.0, %v1444_v31 }
 0x189   : > { %v329_v60 = vmax.f32 %v2914_v46, %v2916_v58  ;;  %v311_v12 = vmin.f32 %v309_v50, %v310_v17  ;;  %v1750_v20 = vadd.f32 -4.0, %v1444_v31  ;;  %v1751_v21 = vadd.f32 -5.0, %v1444_v31 }
 0x18a   : > { %2001 = vrot.lane.b32.xlu1 %v2000_v52, %s2253_s5  ;;  %v316_v52 = vand.u32 2147483647, %v1734_v0  ;;  %v1452_v19 = vand.u32 2147483647, %v1747_v29  ;;  %v1459_v59 = vand.u32 2147483647, %v1748_v56  ;;  %v325_v39 = vmin.f32 %v323_v15, %v324_v5 }
 0x18b   : > { %1996 = vrot.lane.b32.xlu0 %v1995_v57, %s2252_s29  ;;  %v305_v57 = vmul.f32 2.0, %v304_v16  ;;  %v330_v4 = vmax.f32 %v329_v60, %v2927_v8  ;;  %v1466_v53 = vand.u32 2147483647, %v1749_v24  ;;  %v1473_v35 = vand.u32 2147483647, %v1750_v20 }
 0x18c   : > { %v317_v26 = vsub.f32 8.0, %v316_v52  ;;  %v1453_v36 = vsub.f32 8.0, %v1452_v19  ;;  %v1460_v3 = vsub.f32 8.0, %v1459_v59  ;;  %v1753_v60 = vadd.f32 -7.0, %v1444_v31 }
 0x18d   : > { %v1467_v13 = vsub.f32 8.0, %v1466_v53  ;;  %v1474_v10 = vsub.f32 8.0, %v1473_v35  ;;  %v326_v56 = vmul.f32 2.0, %v325_v39 }
 0x18e   : > { %2006 = vrot.lane.b32.xlu1 %v2005_v30, %s2255_s28  ;;  %v1387_v30 = vcombine.high %v1383_v62, %v2246_v40  ;;  %v318_v38 = vmin.f32 %v316_v52, %v317_v26  ;;  %v1454_v44 = vmin.f32 %v1452_v19, %v1453_v36  ;;  %v1461_v48 = vmin.f32 %v1459_v59, %v1460_v3 }
 0x18f   : > { %2011 = vrot.lane.b32.xlu0 %v2010_v11, %s2253_s5  ;;  %v306_v11 = vmul.f32 %v305_v57, %v305_v57  ;;  %v1468_v7 = vmin.f32 %v1466_v53, %v1467_v13  ;;  %v1475_v63 = vmin.f32 %v1473_v35, %v1474_v10  ;;  %v1494_v5 = vand.u32 2147483647, %v1753_v60 }
 0x190   : > { %v319_v2 = vmul.f32 2.0, %v318_v38  ;;  %v1455_v16 = vmul.f32 2.0, %v1454_v44  ;;  %v1462_v50 = vmul.f32 2.0, %v1461_v48  ;;  %v327_v39 = vmul.f32 %v326_v56, %v326_v56 }
 0x191   : > { %v2944_v6 = vmul.f32 -0.5, %v306_v11  ;;  %v1469_v52 = vmul.f32 2.0, %v1468_v7  ;;  %v1476_v42 = vmul.f32 2.0, %v1475_v63  ;;  %v1495_v11 = vsub.f32 8.0, %v1494_v5 }
 0x192   : > { %2016 = vrot.lane.b32.xlu1 %v2015_v54, %s2254_s23  ;;  %v1446_v54 = vsub.f32 8.0, %v1445_v47  ;;  %v1456_v57 = vmul.f32 %v1455_v16, %v1455_v16  ;;  %v1463_v17 = vmul.f32 %v1462_v50, %v1462_v50 }
 0x193   : > { %2021 = vrot.lane.b32.xlu0 %v2020_v23, %s2254_s23  ;;  %v331_v23 = vmax.f32 %v330_v4, %v2939_v27  ;;  %v1470_v28 = vmul.f32 %v1469_v52, %v1469_v52  ;;  %v1477_v29 = vmul.f32 %v1476_v42, %v1476_v42  ;;  %v1496_v59 = vmin.f32 %v1494_v5, %v1495_v11 }
 0x194   : > { %v1447_v61 = vmin.f32 %v1445_v47, %v1446_v54  ;;  %v1457_v4 = vmul.f32 -0.5, %v1456_v57  ;;  %v1464_v47 = vmul.f32 -0.5, %v1463_v17 }
 0x195   : > { %v1471_v20 = vmul.f32 -0.5, %v1470_v28  ;;  %v1478_v53 = vmul.f32 -0.5, %v1477_v29  ;;  %v1497_v36 = vmul.f32 2.0, %v1496_v59 }
 0x196   : > { %2026 = vrot.lane.b32.xlu1 %v2025_v45, %s2255_s28  ;;  %v1480_v45 = vand.u32 2147483647, %v1751_v21  ;;  %v1448_v55 = vmul.f32 2.0, %v1447_v61 }
 0x197   : > { %1389 = vrot.lane.b32.xlu0 %v1384_v32, %s2252_s29  ;;  %v1752_v32 = vadd.f32 -6.0, %v1444_v31  ;;  %v332_v31 = vmax.f32 %v331_v23, %v2944_v6 }
 0x198   : > { %v1481_v0 = vsub.f32 8.0, %v1480_v45 }
 0x199   : > { %v1487_v15 = vand.u32 2147483647, %v1752_v32  ;;  %v1498_v32 = vmul.f32 %v1497_v36, %v1497_v36 }
 0x19a   : > { %2031 = vrot.lane.b32.xlu1 %v2030_v43, %s2255_s28  ;;  %v312_v43 = vmul.f32 2.0, %v311_v12  ;;  %v320_v12 = vmul.f32 %v319_v2, %v319_v2 }
 0x19b   : > { %1397 = vrot.lane.b32.xlu0 %v1385_v14, %s2253_s5  ;;  %v1449_v14 = vmul.f32 %v1448_v55, %v1448_v55  ;;  %v1499_v48 = vmul.f32 -0.5, %v1498_v32 }
 0x19c   : > { %v313_v26 = vmul.f32 %v312_v43, %v312_v43  ;;  %v2949_v13 = vmul.f32 -0.5, %v320_v12  ;;  %v2952_v43 = vmul.f32 -0.5, %v327_v39 }
 0x19e   : > { %1409 = vrot.lane.b32.xlu1 %v1383_v62, %s2251_s15  ;;  %v1482_v62 = vmin.f32 %v1480_v45, %v1481_v0  ;;  %v2946_v54 = vmul.f32 -0.5, %v313_v26  ;;  %s1756_s15 = sshll.u32 %s2225_s19, 1  ;;  %s2115_s19 = scalar_lea.vmem %s3128_s30, 128 }
 0x19f   : > { %1405 = vrot.lane.b32.xlu0 %v1386_v34, %s2254_s23  ;;  %v1450_v34 = vmul.f32 -0.5, %v1449_v14  ;;  %s1623_s29 = sadd.s32 %s2221_s18, %s1756_s15  ;;  %s1612_s18 = scalar_lea.sflag [#allocation5], %s200_s24 }
 0x1a0   : > { %v1483_v49 = vmul.f32 2.0, %v1482_v62  ;;  %v333_v10 = vmax.f32 %v332_v31, %v2946_v54  ;;  %s1757_s4 = sshll.u32 %s1623_s29, 7  ;;  %p2116_p7 = scmp.ne.s32.totalorder %s3128_s30, %s2115_s19 }
 0x1a1   : > { %v1500_v38 = vmax.f32 %v1450_v34, %v1457_v4  ;;  %s2121_s15 = scalar_lea.vmem %s2120_s11, 256 }
 0x1a2   : > { %v1484_v21 = vmul.f32 %v1483_v49, %v1483_v49  ;;  %v334_v23 = vmax.f32 %v333_v10, %v2949_v13  ;;  %p2117_p4 = pnand %p2116_p7, %p3205_p2  ;;  %p2123_p6 = scmp.lt.s32.totalorder %s2121_s15, %s2115_s19 }
 0x1a3   : > { %1413 = vrot.lane.b32.xlu0 %v1387_v30, %s2255_s28  ;;  %v1488_v30 = vsub.f32 8.0, %v1487_v15  ;;  %v1501_v35 = vmax.f32 %v1500_v38, %v1464_v47  ;;  %s3126_s28 = scalar_lea.hbm %s3195_s3, %s1757_s4 }
 0x1a4   : > { %v1485_v3 = vmul.f32 -0.5, %v1484_v21  ;;  %v2956_v63 = vmax.f32 %v334_v23, %v2952_v43  ;;  %p2118_p0 = pneg %p2117_p4  ;;  %p2124_p9 = por %p2123_p6, %p2122_p1 }
 0x1a5   : > { %v1489_v24 = vmin.f32 %v1487_v15, %v1488_v30  ;;  %v1502_v45 = vmax.f32 %v1501_v35, %v1471_v20 }
 0x1a6   : > { %v336_v49 = vsub.f32 %v2914_v46, %v2956_v63  ;;  %v342_v30 = vsub.f32 %v2916_v58, %v2956_v63  ;;  %v348_v56 = vsub.f32 %v2927_v8, %v2956_v63  ;;  %v360_v35 = vsub.f32 %v2944_v6, %v2956_v63  ;;  %p2125_p3 = pnand %p2124_p9, %p2118_p0 }
 0x1a7   : > { %v1490_v19 = vmul.f32 2.0, %v1489_v24  ;;  %v1503_v44 = vmax.f32 %v1502_v45, %v1478_v53  ;;  %v354_v24 = vsub.f32 %v2939_v27, %v2956_v63 }
 0x1a8   : > { %v337_v5 = vmul.f32 1.442695, %v336_v49  ;;  %v343_v29 = vmul.f32 1.442695, %v342_v30  ;;  %v349_v58 = vmul.f32 1.442695, %v348_v56 }
 0x1a9   : > { %v1491_v61 = vmul.f32 %v1490_v19, %v1490_v19  ;;  %v1504_v0 = vmax.f32 %v1503_v44, %v1485_v3  ;;  %v361_v44 = vmul.f32 1.442695, %v360_v35 }
 0x1ab   : > { %v1492_v55 = vmul.f32 -0.5, %v1491_v61 }
 0x1ad   : > { %v1505_v2 = vmax.f32 %v1504_v0, %v1492_v55 }
 0x1af   : > { %v1506_v7 = vmax.f32 %v1505_v2, %v1499_v48 }
 0x1b1   : > { %v1507_v14 = vsub.f32 %v1450_v34, %v1506_v7  ;;  %v1513_v16 = vsub.f32 %v1457_v4, %v1506_v7  ;;  %v1519_v50 = vsub.f32 %v1464_v47, %v1506_v7  ;;  %v1525_v62 = vsub.f32 %v1471_v20, %v1506_v7 }
 0x1b2   : > { %v1531_v52 = vsub.f32 %v1478_v53, %v1506_v7  ;;  %v1537_v17 = vsub.f32 %v1485_v3, %v1506_v7  ;;  %v1543_v28 = vsub.f32 %v1492_v55, %v1506_v7  ;;  %v1549_v4 = vsub.f32 %v1499_v48, %v1506_v7 }
 0x1b3   : > { %v1508_v42 = vmul.f32 1.442695, %v1507_v14  ;;  %v1514_v15 = vmul.f32 1.442695, %v1513_v16  ;;  %v1520_v60 = vmul.f32 1.442695, %v1519_v50  ;;  %v366_v48 = vsub.f32 %v2946_v54, %v2956_v63 }
 0x1b4   : > { %v1526_v57 = vmul.f32 1.442695, %v1525_v62  ;;  %v1532_v26 = vmul.f32 1.442695, %v1531_v52  ;;  %v1538_v34 = vmul.f32 1.442695, %v1537_v17  ;;  %v372_v52 = vsub.f32 %v2949_v13, %v2956_v63 }
 0x1b5   : > { %2049 = vpow2.f32 %v1508_v42  ;;  %v1544_v47 = vmul.f32 1.442695, %v1543_v28  ;;  %v1550_v46 = vmul.f32 1.442695, %v1549_v4  ;;  %v355_v53 = vmul.f32 1.442695, %v354_v24 }
 0x1b6   : > { %2051 = vpow2.f32 %v1514_v15  ;;  %v367_v62 = vmul.f32 1.442695, %v366_v48  ;;  %v378_v28 = vsub.f32 %v2952_v43, %v2956_v63 }
 0x1b7   : > { %2053 = vpow2.f32 %v1520_v60 }
 0x1b8   : > { %2055 = vpow2.f32 %v1526_v57 }
 0x1b9   : > { %2057 = vpow2.f32 %v1532_v26 }
 0x1ba   : > { %2059 = vpow2.f32 %v1538_v34  ;;  %v373_v34 = vmul.f32 1.442695, %v372_v52 }
 0x1bb   : > { %2061 = vpow2.f32 %v337_v5 }
 0x1bc   : > { %2063 = vpow2.f32 %v1544_v47 }
 0x1bd   : > { %2065 = vpow2.f32 %v343_v29 }
 0x1be   : > { %2067 = vpow2.f32 %v1550_v46 }
 0x1bf   : > { %v2050_v11 = vpop.eup %2049  ;;  %2069 = vpow2.f32 %v349_v58 }
 0x1c0   : > { %v2052_v12 = vpop.eup %2051  ;;  %v2966_v20 = vpop.permute.xlu1 %1896  ;;  %v1511_v21 = vmul.f32 -1.0, %v2050_v11  ;;  %2071 = vpow2.f32 %v355_v53 }
 0x1c1   : > { %v2054_v38 = vpop.eup %2053  ;;  %v1516_v31 = vadd.f32 %v2052_v12, %v2050_v11  ;;  %v1517_v19 = vmul.f32 -0.42857146, %v2052_v12  ;;  %2073 = vpow2.f32 %v361_v44  ;;  %v379_v11 = vmul.f32 1.442695, %v378_v28 }
 0x1c2   : > { %v2056_v59 = vpop.eup %2055  ;;  %v1523_v27 = vmul.f32 0.14285707, %v2054_v38  ;;  %2075 = vpow2.f32 %v367_v62 }
 0x1c3   : > { %v1518_v61 = vadd.f32 %v1517_v19, %v1511_v21  ;;  %v1522_v36 = vadd.f32 %v2054_v38, %v1516_v31  ;;  %v1529_v3 = vmul.f32 0.7142856, %v2056_v59  ;;  %v2058_v45 = vpop.eup %2057 }
 0x1c4   : > { %v2060_v32 = vpop.eup %2059  ;;  %v2972_v55 = vpop.permute.xlu1 %1906  ;;  %v1535_v6 = vmul.f32 0.71428585, %v2058_v45 }
 0x1c5   : > { %v1524_v39 = vadd.f32 %v1523_v27, %v1518_v61  ;;  %v1528_v10 = vadd.f32 %v2056_v59, %v1522_v36  ;;  %v2062_v0 = vpop.eup %2061  ;;  %v1541_v60 = vmul.f32 0.14285731, %v2060_v32 }
 0x1c6   : > { %v2064_v7 = vpop.eup %2063  ;;  %v340_v47 = vmul.f32 -1.0, %v2062_v0 }
 0x1c7   : > { %v2968_v8 = vpop.permute.xlu0 %1901  ;;  %v1530_v23 = vadd.f32 %v1529_v3, %v1524_v39  ;;  %v1534_v2 = vadd.f32 %v2058_v45, %v1528_v10  ;;  %v2066_v16 = vpop.eup %2065  ;;  %v1547_v4 = vmul.f32 -0.42857122, %v2064_v7 }
 0x1c8   : > { %v2068_v42 = vpop.eup %2067  ;;  %v2980_v54 = vpop.permute.xlu1 %1911  ;;  %v345_v17 = vadd.f32 %v2066_v16, %v2062_v0  ;;  %v346_v29 = vmul.f32 -0.42857146, %v2066_v16 }
 0x1c9   : > { %v1540_v50 = vadd.f32 %v2060_v32, %v1534_v2  ;;  %v1536_v15 = vadd.f32 %v1535_v6, %v1530_v23  ;;  %v2070_v49 = vpop.eup %2069  ;;  %v1553_v12 = vmul.f32 -1.0, %v2068_v42 }
 0x1ca   : > { %v351_v56 = vadd.f32 %v2070_v49, %v345_v17  ;;  %v2072_v46 = vpop.eup %2071  ;;  %v347_v43 = vadd.f32 %v346_v29, %v340_v47  ;;  %v352_v63 = vmul.f32 0.14285707, %v2070_v49  ;;  %v1899_v47 = vunpack.i.h.bf16 %v2966_v20 }
 0x1cb   : > { %v2976_v14 = vpop.permute.xlu0 %1916  ;;  %v1546_v57 = vadd.f32 %v2064_v7, %v1540_v50  ;;  %v1542_v5 = vadd.f32 %v1541_v60, %v1536_v15  ;;  %v2074_v31 = vpop.eup %2073  ;;  %v358_v27 = vmul.f32 0.7142856, %v2072_v46  ;;  %v1909_v29 = vunpack.i.h.bf16 %v2972_v55 }
 0x1cc   : > { %v357_v38 = vadd.f32 %v2072_v46, %v351_v56  ;;  %v353_v35 = vadd.f32 %v352_v63, %v347_v43  ;;  %v2076_v36 = vpop.eup %2075  ;;  %v364_v44 = vmul.f32 0.71428585, %v2074_v31  ;;  %v1914_v56 = vunpack.i.h.bf16 %v2980_v54 }
 0x1cd   : > { %v1552_v30 = vadd.f32 %v2068_v42, %v1546_v57  ;;  %v1548_v58 = vadd.f32 %v1547_v4, %v1542_v5  ;;  %v370_v16 = vmul.f32 0.14285731, %v2076_v36 }
 0x1ce   : > { %v363_v61 = vadd.f32 %v2074_v31, %v357_v38  ;;  %v359_v32 = vadd.f32 %v358_v27, %v353_v35  ;;  %v1903_v31 = vunpack.i.l.bf16 %v2968_v8  ;;  %v1919_v27 = vunpack.i.h.bf16 %v2976_v14 }
 0x1cf   : > { %v2982_v26 = vpop.permute.xlu0 %1926  ;;  %2077 = vrcp.f32 %v1552_v30  ;;  %v1554_v59 = vadd.f32 %v1553_v12, %v1548_v58  ;;  %v1898_v30 = vunpack.i.l.bf16 %v2966_v20  ;;  %v1904_v58 = vunpack.i.h.bf16 %v2968_v8 }
 0x1d0   : > { %2079 = vpow2.f32 %v373_v34  ;;  %v369_v48 = vadd.f32 %v2076_v36, %v363_v61  ;;  %v365_v7 = vadd.f32 %v364_v44, %v359_v32  ;;  %v1918_v61 = vunpack.i.l.bf16 %v2976_v14 }
 0x1d1   : > { %2081 = vpow2.f32 %v379_v11  ;;  %v1913_v11 = vunpack.i.l.bf16 %v2980_v54  ;;  %v1929_v36 = vunpack.i.h.bf16 %v2982_v26 }
 0x1d2   : > { %v3008_v49 = vadd.f32 %v370_v16, %v365_v7 }
 0x1d8   : > { %v2986_v13 = vpop.permute.xlu1 %1921  ;;  %v2988_v24 = vpop.permute.xlu0 %1936 }
 0x1d9   : > { %v2078_v3 = vpop.eup %2077 }
 0x1da   : > { %v1556_v39 = vmul.f32 %v2078_v3, %v1554_v59  ;;  %v2080_v0 = vpop.eup %2079 }
 0x1db   : > { %v375_v50 = vadd.f32 %v2080_v0, %v369_v48  ;;  %v3002_v62 = vpop.eup %2081  ;;  %v3004_v15 = vmul.f32 -0.42857122, %v2080_v0 }
 0x1dc   : > { %1559 = vperm.xlu1 %2035, %v1556_v39  }
 0x1dd   : > { %v3011_v28 = vadd.f32 %v3002_v62, %v375_v50 }
 0x1df   : > { %2083 = vrcp.f32 %v3011_v28 }
 0x1e0   : > { %v2990_v21 = vpop.permute.xlu1 %1931  ;;  %v2992_v19 = vpop.permute.xlu0 %1941 }
 0x1e4   : > { %v2994_v53 = vpop.permute.xlu1 %1946 }
 0x1e5   : > { %v2996_v45 = vpop.permute.xlu0 %1393 }
 0x1e8   : > { %v2998_v10 = vpop.permute.xlu1 %1951 }
 0x1e9   : > { %v1957_v23 = vpop.permute.xlu0 %1956 }
 0x1ea   : > { %v1958_v2 = vunpack.i.l.bf16 %v1957_v23  ;;  %v1959_v52 = vunpack.i.h.bf16 %v1957_v23 }
 0x1ec   : > { %v3000_v6 = vpop.permute.xlu1 %1401  ;;  %v615_v60 = vsel %vm489_vm4, %v2741_v37, %v1958_v2  ;;  %v839_v34 = vsel %vm489_vm4, %v2738_v33, %v1959_v52  ;;  %v1908_v37 = vunpack.i.l.bf16 %v2972_v55  ;;  %v1923_v52 = vunpack.i.l.bf16 %v2986_v13 }
 0x1ed   : > { %v1962_v42 = vpop.permute.xlu0 %1961  ;;  %v616_v33 = vsel %vm491_vm5, %v615_v60, %v1898_v30  ;;  %v840_v63 = vsel %vm491_vm5, %v839_v34, %v1899_v47 }
 0x1ee   : > { %v1963_v57 = vunpack.i.l.bf16 %v1962_v42  ;;  %v1964_v12 = vunpack.i.h.bf16 %v1962_v42  ;;  %v1939_v42 = vunpack.i.h.bf16 %v2988_v24 }
 0x1f0   : > { %v1967_v17 = vpop.permute.xlu1 %1966  ;;  %v490_v43 = vsel %vm489_vm4, %v2773_v9, %v1963_v57  ;;  %v1928_v9 = vunpack.i.l.bf16 %v2982_v26  ;;  %v730_v39 = vsel %vm489_vm4, %v2776_v1, %v1964_v12  ;;  %v1924_v1 = vunpack.i.h.bf16 %v2986_v13 }
 0x1f1   : > { %v1969_v5 = vunpack.i.h.bf16 %v1967_v17  ;;  %v1968_v4 = vunpack.i.l.bf16 %v1967_v17  ;;  %v1972_v46 = vpop.permute.xlu0 %1971  ;;  %v492_v44 = vsel %vm491_vm5, %v490_v43, %v1903_v31  ;;  %v731_v60 = vsel %vm491_vm5, %v730_v39, %v1904_v58 }
 0x1f2   : > { %v1973_v38 = vunpack.i.l.bf16 %v1972_v46  ;;  %v1974_v32 = vunpack.i.h.bf16 %v1972_v46  ;;  %v1938_v17 = vunpack.i.l.bf16 %v2988_v24 }
 0x1f3   : > { %v617_v20 = vsel %vm493_vm6, %v616_v33, %v1968_v4  ;;  %v841_v59 = vsel %vm493_vm6, %v840_v63, %v1969_v5  ;;  %v1934_v33 = vunpack.i.h.bf16 %v2990_v21 }
 0x1f4   : > { %v1977_v55 = vpop.permute.xlu1 %1976  ;;  %v618_v8 = vsel %vm495_vm7, %v617_v20, %v1908_v37  ;;  %v494_v48 = vsel %vm493_vm6, %v492_v44, %v1973_v38  ;;  %v842_v23 = vsel %vm495_vm7, %v841_v59, %v1909_v29  ;;  %v732_v30 = vsel %vm493_vm6, %v731_v60, %v1974_v32 }
 0x1f5   : > { %v1979_v35 = vunpack.i.h.bf16 %v1977_v55  ;;  %v1978_v54 = vunpack.i.l.bf16 %v1977_v55  ;;  %v1982_v3 = vpop.permute.xlu0 %1981  ;;  %v496_v13 = vsel %vm495_vm7, %v494_v48, %v1913_v11  ;;  %v1933_v38 = vunpack.i.l.bf16 %v2990_v21 }
 0x1f6   : > { %v1984_v14 = vunpack.i.h.bf16 %v1982_v3  ;;  %v1983_v26 = vunpack.i.l.bf16 %v1982_v3 }
 0x1f7   : > { %v619_v0 = vsel %vm497_vm8, %v618_v8, %v1978_v54  ;;  %v843_v7 = vsel %vm497_vm8, %v842_v23, %v1979_v35 }
 0x1f8   : > { %v1992_v2 = vpop.permute.xlu1 %1991  ;;  %v1301_v4 = vsel %vm489_vm4, %v2813_v51, %v1984_v14  ;;  %v620_v47 = vsel %vm499_vm9, %v619_v0, %v1918_v61  ;;  %v844_v29 = vsel %vm499_vm9, %v843_v7, %v1919_v27  ;;  %v1073_v46 = vsel %vm489_vm4, %v2824_v22, %v1983_v26 }
 0x1f9   : > { %v1994_v16 = vunpack.i.h.bf16 %v1992_v2  ;;  %v1993_v50 = vunpack.i.l.bf16 %v1992_v2  ;;  %v1987_v57 = vpop.permute.xlu0 %1986  ;;  %v733_v51 = vsel %vm495_vm7, %v732_v30, %v1914_v56  ;;  %v1074_v35 = vsel %vm491_vm5, %v1073_v46, %v1923_v52 }
 0x1fa   : > { %v1989_v34 = vunpack.i.h.bf16 %v1987_v57  ;;  %v1988_v5 = vunpack.i.l.bf16 %v1987_v57  ;;  %v1302_v54 = vsel %vm491_vm5, %v1301_v4, %v1924_v1  ;;  %v1943_v7 = vunpack.i.l.bf16 %v2992_v19 }
 0x1fb   : > { %v621_v58 = vsel %vm501_vm10, %v620_v47, %v1993_v50  ;;  %v845_v24 = vsel %vm501_vm10, %v844_v29, %v1994_v16  ;;  %v1944_v29 = vunpack.i.h.bf16 %v2992_v19 }
 0x1fc   : > { %v2002_v37 = vpop.permute.xlu1 %2001  ;;  %v498_v43 = vsel %vm497_vm8, %v496_v13, %v1988_v5  ;;  %v734_v11 = vsel %vm497_vm8, %v733_v51, %v1989_v34  ;;  %v1424_v22 = vrot.slane %v621_v58, 4  ;;  %v1427_v59 = vrot.slane %v845_v24, 4 }
 0x1fd   : > { %v2003_v12 = vunpack.i.l.bf16 %v2002_v37  ;;  %v2004_v20 = vunpack.i.h.bf16 %v2002_v37  ;;  %v1997_v63 = vpop.permute.xlu0 %1996  ;;  %v500_v56 = vsel %vm499_vm9, %v498_v43, %v1928_v9  ;;  %v735_v48 = vsel %vm499_vm9, %v734_v11, %v1929_v36 }
 0x1fe   : > { %v1999_v55 = vunpack.i.h.bf16 %v1997_v63  ;;  %v1998_v31 = vunpack.i.l.bf16 %v1997_v63  ;;  %v1949_v13 = vunpack.i.h.bf16 %v2994_v53  ;;  %v1948_v37 = vunpack.i.l.bf16 %v2994_v53 }
 0x1ff   : > { %v1075_v61 = vsel %vm493_vm6, %v1074_v35, %v2003_v12  ;;  %v1303_v32 = vsel %vm493_vm6, %v1302_v54, %v2004_v20  ;;  %v1954_v11 = vunpack.i.h.bf16 %v2998_v10  ;;  %v377_v54 = vadd.f32 %v3004_v15, %v3008_v49  ;;  %v2084_v15 = vpop.eup %2083 }
 0x200   : > { %v2007_v27 = vpop.permute.xlu1 %2006  ;;  %v1182_v21 = vsel %vm489_vm4, %v2856_v18, %v1999_v55  ;;  %v958_v44 = vsel %vm489_vm4, %v2847_v41, %v1998_v31  ;;  %v1076_v26 = vsel %vm495_vm7, %v1075_v61, %v1938_v17  ;;  %v1304_v57 = vsel %vm495_vm7, %v1303_v32, %v1939_v42 }
 0x201   : > { %v2009_v3 = vunpack.i.h.bf16 %v2007_v27  ;;  %v2008_v39 = vunpack.i.l.bf16 %v2007_v27  ;;  %v2012_v8 = vpop.permute.xlu0 %2011  ;;  %v959_v41 = vsel %vm491_vm5, %v958_v44, %v1933_v38  ;;  %v1183_v50 = vsel %vm491_vm5, %v1182_v21, %v1934_v33 }
 0x202   : > { %v2014_v0 = vunpack.i.h.bf16 %v2012_v8  ;;  %v2013_v23 = vunpack.i.l.bf16 %v2012_v8  ;;  %v1953_v42 = vunpack.i.l.bf16 %v2998_v10  ;;  %v382_v31 = vmul.f32 -1.0, %v3002_v62 }
 0x203   : > { %v502_v14 = vsel %vm501_vm10, %v500_v56, %v2008_v39  ;;  %v736_v2 = vsel %vm501_vm10, %v735_v48, %v2009_v3 }
 0x204   : > { %v2017_v9 = vpop.permute.xlu1 %2016  ;;  %v1436_v16 = vsel %vm1435_vm11, %v502_v14, %v1424_v22  ;;  %v1437_v18 = vsel %vm1435_vm11, %v736_v2, %v1427_v59  ;;  %v960_v52 = vsel %vm493_vm6, %v959_v41, %v2013_v23  ;;  %v1184_v60 = vsel %vm493_vm6, %v1183_v50, %v2014_v0 }
 0x205   : > { %v2019_v36 = vunpack.i.h.bf16 %v2017_v9  ;;  %v2018_v1 = vunpack.i.l.bf16 %v2017_v9  ;;  %v2022_v30 = vpop.permute.xlu0 %2021  ;;  %v1440_v34 = vpack.c.bf16 %v1437_v18, %v1436_v16  ;;  %v961_v58 = vsel %vm495_vm7, %v960_v52, %v1943_v7 }
 0x206   : > { %v2024_v4 = vunpack.i.h.bf16 %v2022_v30  ;;  %v2023_v47 = vunpack.i.l.bf16 %v2022_v30  ;;  %v1185_v19 = vsel %vm495_vm7, %v1184_v60, %v1944_v29  ;;  %v383_v48 = vadd.f32 %v382_v31, %v377_v54 }
 0x207   : > { %v1077_v17 = vsel %vm497_vm8, %v1076_v26, %v2018_v1  ;;  %v1305_v5 = vsel %vm497_vm8, %v1304_v57, %v2019_v36  ;;  %1766 = vmatpush3.bf16.msra.mxu0 %v1440_v34 }
 0x208   : > { %v2027_v46 = vpop.permute.xlu1 %2026  ;;  %1767 = vmatprep.subr.bf16.mxu0 %v2246_v40  ;;  %v962_v33 = vsel %vm497_vm8, %v961_v58, %v2023_v47  ;;  %v1078_v43 = vsel %vm499_vm9, %v1077_v17, %v1948_v37  ;;  %v1306_v53 = vsel %vm499_vm9, %v1305_v5, %v1949_v13  ;;  %v1186_v20 = vsel %vm497_vm8, %v1185_v19, %v2024_v4 }
 0x209   : > { %v2029_v24 = vunpack.i.h.bf16 %v2027_v46  ;;  %v2028_v12 = vunpack.i.l.bf16 %v2027_v46  ;;  %v1390_v51 = vpop.permute.xlu0 %1389  ;;  %v963_v35 = vsel %vm499_vm9, %v962_v33, %v1953_v42  ;;  %v1187_v3 = vsel %vm499_vm9, %v1186_v20, %v1954_v11 }
 0x20a   : > { %v1416_v38 = vsel %vm489_vm4, %v2901_v25, %v1390_v51  ;;  %v385_v2 = vmul.f32 %v2084_v15, %v383_v48 }
 0x20b   : > { %v1079_v28 = vsel %vm501_vm10, %v1078_v43, %v2028_v12  ;;  %v1307_v63 = vsel %vm501_vm10, %v1306_v53, %v2029_v24  ;;  %v1417_v39 = vsel %vm491_vm5, %v1416_v38, %v2996_v45 }
 0x20c   : > { %v2032_v55 = vpop.permute.xlu1 %2031  ;;  %v1430_v27 = vrot.slane %v1079_v28, 4  ;;  %v1433_v61 = vrot.slane %v1307_v63, 4  ;;  %v386_v26 = vpack.c.bf16 %v385_v2, %v385_v2 }
 0x20d   : > { %v2034_v22 = vunpack.i.h.bf16 %v2032_v55  ;;  %v2033_v59 = vunpack.i.l.bf16 %v2032_v55  ;;  %v1398_v25 = vpop.permute.xlu0 %1397 }
 0x20e   : > { %v1418_v62 = vsel %vm493_vm6, %v1417_v39, %v1398_v25 }
 0x20f   : > { %v964_v10 = vsel %vm501_vm10, %v963_v35, %v2033_v59  ;;  %v1188_v56 = vsel %vm501_vm10, %v1187_v3, %v2034_v22  ;;  %v1419_v49 = vsel %vm495_vm7, %v1418_v62, %v3000_v6 }
 0x210   : > { %v1438_v32 = vsel %vm1435_vm11, %v964_v10, %v1430_v27  ;;  %v1439_v21 = vsel %vm1435_vm11, %v1188_v56, %v1433_v61  ;;  %v1410_v0 = vpop.permute.xlu1 %1409 }
 0x211   : > { %v1441_v44 = vpack.c.bf16 %v1439_v21, %v1438_v32  ;;  %v1406_v8 = vpop.permute.xlu0 %1405 }
 0x212   : > { %v1420_v45 = vsel %vm497_vm8, %v1419_v49, %v1406_v8 }
 0x213   : > { %1768 = vmatpush3.bf16.msra.mxu0 %v1441_v44  ;;  %v1421_v23 = vsel %vm499_vm9, %v1420_v45, %v1410_v0 }
 0x214   : > { %1769 = vmatprep.subr.bf16.mxu0 %v2246_v40 }
 0x215   : > { %v1414_v14 = vpop.permute.xlu0 %1413 }
 0x216   : > { %v1422_v7 = vsel %vm501_vm10, %v1421_v23, %v1414_v14 }
 0x217   : > { %v1442_v9 = vpack.c.bf16 %v1422_v7, %v1422_v7 }
 0x219   : > { %v1568_v6 = vsel %vm1566_vm12, %v1442_v9, 0 }
 0x21a   : > { %1770 = vmatpush3.bf16.msra.mxu0 %v1568_v6 }
 0x21d   : > { %1772 = vmatmul.mubr.msk.bf16.vlgmr.msra.gmra.mrb[0].mxu0 %vm1562_vm13, %v386_v26 }
 0x25b   : > { %v1560_v40 = vpop.permute.xlu1 %1559 }
 0x2f0   : > { %v1604_v16 = vpop.f32.mrb[0].mxu0 }
 0x2f1   : > { %v1605_v18 = vadd.f32 %v1604_v16, %v1560_v40  ;;  %v1773_v41 = vpop.f32.mrb[1].mxu0 }
 0x2f2   : > { %v1607_v50 = vpop.f32.mrb[2].mxu0 }
 0x2f3   : > { %1610 = vst [vmem:[%s202_s6] sm:$0xff] %v1605_v18  ;;  %v1774_v36 = vpop.f32.mrb[3].mxu0 }
 0x2f4   : > { %2128 = shalt.err (!%p2125_p3)
}
 0x2f5   : > { %s2129_s24 = scalar_lea.hbm %s3126_s28, 128  ;;  %s2133_s29 = scalar_lea.hbm %s3195_s3, 512 }
 0x2f6   : > { %p2130_p11 = scmp.ne.s32.totalorder %s3126_s28, %s2129_s24  ;;  %p2134_p8 = scmp.lt.u32.totalorder %s3126_s28, %s3195_s3 }
 0x2f7   : > { %p2135_p10 = scmp.lt.u32.totalorder %s2133_s29, %s2129_s24  ;;  %p2137_p7 = scmp.lt.u32.totalorder %s2129_s24, %s3126_s28 }
 0x2f8   : > { %p2131_p13 = pnand %p2130_p11, %p3205_p2 }
 0x2f9   : > { %p2136_p12 = por %p2135_p10, %p2134_p8 }
 0x2fa   : > { %p2132_p5 = pneg %p2131_p13 }
 0x2fb   : > { %p2138_p4 = por %p2137_p7, %p2136_p12 }
 0x2fd   : > { %p2139_p0 = pnand %p2138_p4, %p2132_p5 }
 0x2ff   : > { %2142 = shalt.err (!%p2139_p0)
}
 0x300   : > { %1777 = dma.vmem_to_hbm [thread:$0]  (%p3205_p2), %s3128_s30, 128, %s3126_s28, %s1612_s18  }
 0x301 PF: > { %p1788_p1 = scmp.ge.s32.totalorder %s2237_s22, 2  ;;  %s1639_s23 = sand.u32 1, %s2197_s12  }
 0x302   : > { %p3206_p6 = scmp.ne.s32.totalorder %s3202_s10, 0  ;;  %s1640_s19 = scalar_lea.sflag [#allocation5], %s1639_s23 }
 0x304   : > { %p1784_p9 = pnand %p1788_p1, %p3206_p6 }
 0x306   : > { %2192 = dma.done.wait (!%p1784_p9), %s1640_s19, 128  }
 0x307   : > { %2194 = vsyncadd (!%p1784_p9), %s1640_s19, 4294967168  ;;  %s19_s22 = sadd.s32 1, %s2237_s22   ;;  %s3207_s7 = sld [smem:[#allocation9_spill]] }
 0x308   : > { %p16_p3 = scmp.ge.s32.totalorder %s19_s22, 6   ;;  %s3208_s12 = smov %s2201_s13 }
 0x309   : > { %s3209_s13 = smov %s2205_s14  ;;  %s3210_s14 = smov %s2369_s9 }
 0x30a   : > { %s3211_s15 = smov %s2213_s16  ;;  %s3212_s16 = smov %s2217_s17 }
 0x30b   : > { %s3213_s17 = smov %s2366_s8  ;;  %s3214_s18 = smov %s2229_s20 }
 0x30c   : > { %s3215_s19 = smov %s2233_s21  ;;  %s3216_s20 = smov %s3219_s25 }
 0x30d   : > { %s3217_s21 = smov %s3207_s7  ;;  %18 = sbr.rel (!%p16_p3) target bundleno = 9 (0x9), region = 84 }
 0x314   :  { %1645 = vsyncpa [#allocation4], 1 }
 0x315   :  { %1647 = vsyncpa [#allocation4 + $0x1], 1 }
 0x316   :  { %1648 = vsyncpa [#allocation5], 1 }
 0x317   :  { %1650 = vsyncpa [#allocation5 + $0x1], 1 }

</bundles_post_ra>
